<compile_context>
chip_gen: v6e
topology: v6e:2x2x1
jax: 0.10.0
libtpu: 0.0.40
codegen_flags: <defaults>
</compile_context>

<pallas_src>
import functools

import jax
import jax.numpy as jnp
import numpy as np
from jax import lax
from jax.experimental import pallas as pl
from jax.experimental.pallas import tpu as pltpu
from jax.scipy.special import logsumexp

NEG_INF = -1000000.0  # matches the PyTorch module's NEG_INF constant


def _round_up(x, m):
    return ((x + m - 1) // m) * m


# -----------------------------------------------------------------------------
# Pallas kernel: Tt semi-Markov DP steps per grid iteration.
# grid = (batch_tile, time_block); all scratch indexing is static.
# -----------------------------------------------------------------------------
def hsmm_dp_kernel(em_ref,      # VMEM (Tt, kn, Bt, Zp) em_dtype  end-indexed emissions (+NEG_INF for t<n)
                   lenem_ref,   # VMEM (kn, 1, Zp)      f32       log_softmax length emission, rows min_len..K-1
                   trans_ref,   # VMEM (Zp, Zp)         f32/bf16  exp(log_softmax(trans)), padding zeroed
                   len_ref,     # VMEM (Bt, Zp)         int32     final DP step per example (lane-broadcast)
                   out_ref,     # VMEM (Bt, Zp)         f32       captured alpha at t == length
                   win_sc,      # VMEM (K-1, Bt, Zp)    f32       alpha window: slot k = alpha[t0 - k]
                   cap_sc,      # VMEM (Bt, Zp)         f32       running capture accumulator
                   *, Bt, Zp, K, kn, Tt, min_len, initial_state, log_z, mxu_dtype):
    it = pl.program_id(1)

    # ---- per-batch-tile init (first time block only) -------------------------
    @pl.when(it == 0)
    def _init():
        lane = lax.broadcasted_iota(jnp.int32, (Bt, Zp), 1)
        alpha0 = jnp.where(lane == initial_state, 0.0, NEG_INF).astype(jnp.float32)
        win_sc[0] = alpha0                               # alpha[0]
        for k in range(1, K - 1):                        # alpha[-k]: impossible
            win_sc[k] = jnp.full((Bt, Zp), NEG_INF, jnp.float32)
        cap_sc[...] = alpha0                             # covers x_lengths == 0

    expT = trans_ref[...]                                # (Zp, Zp)
    lenem = lenem_ref[...]                               # (kn, 1, Zp)
    lens = len_ref[...]                                  # (Bt, Zp) int32

    # alpha window and capture carried as values through the unrolled loop
    window = [win_sc[k] for k in range(K - 1)]           # window[k] = alpha[t0 - k]
    cap = cap_sc[...]
    t0 = it * Tt

    for j in range(Tt):
        t = t0 + (j + 1)                                 # DP step 1..T_pad

        # previous alphas for every admissible segment length n = min_len..K-1
        prev = jnp.stack([window[n - 1] for n in range(min_len, K)], axis=0)  # (kn, Bt, Zp)

        # transition logsumexp in the exp domain on the MXU
        m = jnp.max(prev, axis=-1, keepdims=True)        # (kn, Bt, 1)
        p = jnp.exp(prev - m)
        d = jnp.dot(p.reshape(kn * Bt, Zp).astype(mxu_dtype), expT,
                    preferred_element_type=jnp.float32).reshape(kn, Bt, Zp)

        # per-length scores (no per-n log): c_n = m_n + log P(n|z) + emission
        c = m + lenem + em_ref[j].astype(jnp.float32)    # (kn, Bt, Zp)

        # single-shift logsumexp over segment lengths:
        #   alpha[t] = log sum_n d_n * exp(c_n);   d_n <= Z so shift by log Z.
        shift = jnp.max(c, axis=0) + log_z               # (Bt, Zp)
        s = jnp.sum(d * jnp.exp(c - shift[None]), axis=0)
        new_alpha = shift + jnp.log(s + 1e-38)

        # vectorized per-example boundary capture (full-vreg select)
        cap = jnp.where(lens == t, new_alpha, cap)

        # slide the alpha window (all static)
        window = [new_alpha] + window[:K - 2]

    # write back carried state; output written unconditionally every grid step
    for k in range(K - 1):
        win_sc[k] = window[k]
    cap_sc[...] = cap
    out_ref[...] = cap


# -----------------------------------------------------------------------------
# Wrapper: emission gather / masking, padding, parameter plumbing
# -----------------------------------------------------------------------------
def hsmm_forward(x_lengths, trans_logits, length_em_param, em_params, subseq_ids,
                 *, Z, B, T, min_len, max_len, pad_id, unk_id, initial_state,
                 batch_tile=None, time_block=None, em_dtype=jnp.bfloat16,
                 vmem_budget_bytes=40 * 1024 * 1024):
    K = min(max_len + 1, T)
    assert min_len >= 1 and K > min_len, "sequence too short for the minimum segment length"
    kn = K - min_len
    Zp = _round_up(max(Z, 128), 128)

    em_bytes = jnp.dtype(em_dtype).itemsize
    sub = 16 if em_bytes == 2 else 8                     # native sublane packing
    if batch_tile is None:
        batch_tile = min(_round_up(B, sub), 64)
    Bt = _round_up(int(batch_tile), sub)
    Bp = _round_up(max(B, Bt), Bt)
    NB = Bp // Bt

    # time block: amortize per-grid-step overhead, bounded by a v7x-safe VMEM budget
    if time_block is None:
        per_step = kn * Bt * Zp * em_bytes
        resident = 4 * (2 * Zp * Zp + 2 * kn * Zp + (K - 1) * Bt * Zp + 6 * Bt * Zp)
        avail = max(vmem_budget_bytes - resident, 2 * per_step)
        time_block = max(1, min(T, avail // (2 * per_step), 16))
    Tt = int(time_block)
    T_pad = _round_up(T, Tt)
    NT = T_pad // Tt

    mxu_dtype = jnp.bfloat16 if Zp >= 256 else jnp.float32

    # ---- precomputed tables (review: no in-kernel softmaxes) ----------------
    # exp(log_softmax(trans)) with padded source rows / dest cols zeroed.
    exp_trans = jnp.exp(jax.nn.log_softmax(trans_logits.astype(jnp.float32), axis=-1))
    exp_trans = jnp.pad(exp_trans, ((0, Zp - Z), (0, Zp - Z))).astype(mxu_dtype)

    # log_softmax of the length emission over lengths 0..max_len; keep rows min_len..K-1.
    pad_logits = jnp.full((Z, min_len), NEG_INF, jnp.float32)
    lenem_full = jax.nn.log_softmax(
        jnp.concatenate([pad_logits, length_em_param.astype(jnp.float32)], axis=-1), axis=-1)
    lenem_sel = lenem_full[:, min_len:K].T.reshape(kn, 1, Z)
    lenem_sel = jnp.pad(lenem_sel, ((0, 0), (0, 0), (0, Zp - Z)))       # (kn, 1, Zp)

    # ---- emission scores, END-position indexed, only n >= min_len rows -------
    rows = []
    for n in range(min_len, K):
        W = em_params[n]                                  # (V_n, Z)
        logW = jax.nn.log_softmax(W.astype(jnp.float32), axis=0)
        ids = subseq_ids[n].astype(jnp.int32)             # (B, L_n)
        V = W.shape[0]
        ids = jnp.where(ids >= V, unk_id, ids)
        sc = logW[ids]                                    # (B, L_n, Z)
        sc = jnp.where((ids == unk_id)[..., None], NEG_INF, sc)
        sc = jnp.where((ids == pad_id)[..., None], 0.0, sc)
        ln = ids.shape[1]
        # start s -> end boundary t = s + n, stored at row t - 1.
        # Leading (t < n) rows are impossible -> NEG_INF (replaces the in-kernel mask).
        sc = jnp.pad(sc, ((0, 0), (n - 1, T_pad - ln - (n - 1)), (0, 0)),
                     constant_values=NEG_INF)
        rows.append(sc)                                   # (B, T_pad, Z)
    em = jnp.stack(rows, axis=2)                          # (B, T_pad, kn, Z)

    em = jnp.pad(em, ((0, Bp - B), (0, 0), (0, 0), (0, 0)))               # batch pad: zeros
    em = jnp.pad(em, ((0, 0), (0, 0), (0, 0), (0, Zp - Z)),
                 constant_values=NEG_INF)                                 # state pad: impossible
    # (Bp, T_pad, kn, Zp) -> (NB, NT, Tt, kn, Bt, Zp) -> (NB*NT*Tt, kn, Bt, Zp)
    em = em.reshape(NB, Bt, NT, Tt, kn, Zp).transpose(0, 2, 3, 4, 1, 5)
    em = em.reshape(NB * NT * Tt, kn, Bt, Zp).astype(em_dtype)

    # per-example final DP step, broadcast across lanes for a full-vreg select
    fin = jnp.clip(x_lengths.astype(jnp.int32), 0, T)
    fin = jnp.pad(fin, (0, Bp - B))
    fin_b = jnp.broadcast_to(fin[:, None], (Bp, Zp)).astype(jnp.int32)

    kernel = functools.partial(
        hsmm_dp_kernel, Bt=Bt, Zp=Zp, K=K, kn=kn, Tt=Tt,
        min_len=min_len, initial_state=initial_state,
        log_z=float(np.log(Z)), mxu_dtype=mxu_dtype)

    need = (2 * Tt * kn * Bt * Zp * em_bytes
            + 2 * Zp * Zp * jnp.dtype(mxu_dtype).itemsize
            + 2 * kn * Zp * 4 + 4 * Bt * Zp * 4 + 2 * Bt * Zp * 4
            + (K - 1) * Bt * Zp * 4 + Bt * Zp * 4)
    vmem_limit = int(min(max(2 * need, 8 << 20), 64 << 20))

    cost = pl.CostEstimate(
        flops=int(2 * NB * NT * Tt * kn * Bt * Zp * Zp),
        transcendentals=int(NB * NT * Tt * (2 * kn + 1) * Bt * Zp),
        bytes_accessed=int(em.size * em_bytes + exp_trans.size * exp_trans.dtype.itemsize
                           + lenem_sel.size * 4 + fin_b.size * 4 + Bp * Zp * 4),
    )

    out = pl.pallas_call(
        kernel,
        out_shape=jax.ShapeDtypeStruct((Bp, Zp), jnp.float32),
        grid_spec=pltpu.PrefetchScalarGridSpec(
            num_scalar_prefetch=0,
            grid=(NB, NT),
            in_specs=[
                pl.BlockSpec((Tt, kn, Bt, Zp), lambda ib, it: (ib * NT + it, 0, 0, 0)),
                pl.BlockSpec((kn, 1, Zp), lambda ib, it: (0, 0, 0)),
                pl.BlockSpec((Zp, Zp), lambda ib, it: (0, 0)),
                pl.BlockSpec((Bt, Zp), lambda ib, it: (ib, 0)),
            ],
            out_specs=pl.BlockSpec((Bt, Zp), lambda ib, it: (ib, 0)),
            scratch_shapes=[
                pltpu.VMEM((K - 1, Bt, Zp), jnp.float32),   # alpha window
                pltpu.VMEM((Bt, Zp), jnp.float32),          # capture accumulator
            ],
        ),
        compiler_params=pltpu.CompilerParams(
            dimension_semantics=("parallel", "arbitrary"),
            vmem_limit_bytes=vmem_limit,
        ),
        cost_estimate=cost,
    )(em, lenem_sel, exp_trans, fin_b)

    # final logsumexp over the real states (tiny; done host-side in plain JAX)
    return logsumexp(out[:B, :Z], axis=-1)


# -----------------------------------------------------------------------------
# Pure-JAX reference (same semantics) for the correctness check
# -----------------------------------------------------------------------------
def hsmm_forward_ref(x_lengths, trans_logits, length_em_param, em_params,
                     subseq_ids, *, Z, B, T, min_len, max_len, pad_id, unk_id,
                     initial_state, em_dtype=jnp.float32):
    K = min(max_len + 1, T)
    pad_logits = jnp.full((Z, min_len), NEG_INF, jnp.float32)
    lenem = jax.nn.log_softmax(
        jnp.concatenate([pad_logits, length_em_param.astype(jnp.float32)], axis=-1), axis=-1)
    trans = jax.nn.log_softmax(trans_logits.astype(jnp.float32), axis=-1)

    em = jnp.zeros((B, T, K, Z), jnp.float32)
    for n in range(min_len, K):
        W = em_params[n]
        logW = jax.nn.log_softmax(W.astype(jnp.float32), axis=0)
        ids = subseq_ids[n].astype(jnp.int32)
        V = W.shape[0]
        ids = jnp.where(ids >= V, unk_id, ids)
        sc = logW[ids]
        sc = jnp.where((ids == unk_id)[..., None], NEG_INF, sc)
        sc = jnp.where((ids == pad_id)[..., None], 0.0, sc)
        # match the kernel's streamed emission precision (bf16 round-trip if used)
        sc = sc.astype(em_dtype).astype(jnp.float32)
        em = em.at[:, :ids.shape[1], n, :].add(sc)

    init = jnp.full((Z,), NEG_INF, jnp.float32).at[initial_state].set(0.0)
    alpha = jnp.full((T + 1, B, Z), NEG_INF, jnp.float32)
    alpha = alpha.at[0].set(jnp.broadcast_to(init[None, :], (B, Z)))
    for t in range(1, T + 1):
        scores = []
        for n in range(min_len, K):
            if t - n >= 0:
                prev = alpha[t - n]
                tsc = logsumexp(prev[:, :, None] + trans[None, :, :], axis=1)
                sc = tsc + lenem[:, n][None, :] + em[:, t - n, n, :]
            else:
                sc = jnp.full((B, Z), NEG_INF, jnp.float32)
            scores.append(sc)
        alpha = alpha.at[t].set(logsumexp(jnp.stack(scores, 0), axis=0))
    outs = [logsumexp(alpha[int(x_lengths[b]), b], axis=-1) for b in range(B)]
    return jnp.stack(outs)


# -----------------------------------------------------------------------------
def xavier_uniform(key, shape):
    fan_out, fan_in = shape
    a = (6.0 / (fan_in + fan_out)) ** 0.5
    return jax.random.uniform(key, shape, jnp.float32, -a, a)


if __name__ == "__main__":
    key = jax.random.PRNGKey(0)

    # small shapes consistent with the module
    Z = 8
    subseq_vocab_sizes = {1: 32, 2: 32, 3: 32}
    min_len, max_len = min(subseq_vocab_sizes), max(subseq_vocab_sizes)
    B, T = 2, 8
    pad_id, unk_id, initial_state = 0, 1, 0

    keys = jax.random.split(key, 10)
    trans_logits = xavier_uniform(keys[0], (Z, Z))
    length_em_param = xavier_uniform(keys[1], (Z, max_len - min_len + 1))
    em_params = {}
    for i, n in enumerate(sorted(subseq_vocab_sizes)):
        em_params[n] = xavier_uniform(keys[2 + i], (subseq_vocab_sizes[n], Z))

    # subseq_ids[n]: n-gram ids per start position (includes pad / unk /
    # out-of-vocab ids to exercise the masking path)
    subseq_ids = {}
    for i, n in enumerate(sorted(subseq_vocab_sizes)):
        Ln = T - n + 1
        subseq_ids[n] = jax.random.randint(
            keys[5 + i], (B, Ln), 0, subseq_vocab_sizes[n] + 4, dtype=jnp.int32)

    x_lengths = jnp.array([T, T - 2], dtype=jnp.int32)

    kwargs = dict(Z=Z, B=B, T=T, min_len=min_len, max_len=max_len,
                  pad_id=pad_id, unk_id=unk_id, initial_state=initial_state)

    # bf16 emission streaming (per perf review); the reference applies the same
    # emission quantization so the DP math is validated tightly.  Pass
    # em_dtype=jnp.float32 to both for exact parity with the f32 PyTorch module.
    logits = hsmm_forward(x_lengths, trans_logits, length_em_param,
                          em_params, subseq_ids, em_dtype=jnp.bfloat16, **kwargs)
    logits = jax.block_until_ready(logits)

    ref = hsmm_forward_ref(x_lengths, trans_logits, length_em_param,
                           em_params, subseq_ids, em_dtype=jnp.bfloat16, **kwargs)
    np.testing.assert_allclose(np.asarray(logits), np.asarray(ref),
                               rtol=1e-3, atol=1e-3)
    print("KERNEL_OK")
</pallas_src>

<mosaic_0001>
module attributes {stable_mosaic.version = 11 : i64} {
  func.func @hsmm_dp_kernel(%arg0: i32, %arg1: i32, %arg2: memref<8x3x16x128xbf16, #tpu.memory_space<vmem>>, %arg3: memref<3x1x128xf32, #tpu.memory_space<vmem>>, %arg4: memref<128x128xf32, #tpu.memory_space<vmem>>, %arg5: memref<16x128xi32, #tpu.memory_space<vmem>>, %arg6: memref<16x128xf32, #tpu.memory_space<vmem>>, %arg7: memref<3x16x128xf32, #tpu.memory_space<vmem>>, %arg8: memref<16x128xf32, #tpu.memory_space<vmem>>) attributes {dimension_semantics = [#tpu.dimension_semantics<parallel>, #tpu.dimension_semantics<arbitrary>], iteration_bounds = array<i64: 1, 1>, scalar_prefetch = 0 : i64, scratch_operands = 2 : i64, tpu.core_type = #tpu.core_type<tc>, window_params = [{transform_indices = @transform_0, window_bounds = array<i64: 8, 3, 16, 128>}, {pipeline_mode = #tpu.pipeline_mode<synchronous>, transform_indices = @transform_1, window_bounds = array<i64: 3, 1, 128>}, {pipeline_mode = #tpu.pipeline_mode<synchronous>, transform_indices = @transform_2, window_bounds = array<i64: 128, 128>}, {transform_indices = @transform_3, window_bounds = array<i64: 16, 128>}, {transform_indices = @transform_4, window_bounds = array<i64: 16, 128>}]} {
    %c0_i32 = arith.constant 0 : i32
    %0 = arith.cmpi eq, %arg1, %c0_i32 : i32
    %1 = arith.extui %0 : i1 to i32
    %c0_i32_0 = arith.constant 0 : i32
    %2 = arith.cmpi ne, %1, %c0_i32_0 : i32
    scf.if %2 {
      %313 = tpu.iota {dimensions = array<i32: 1>} : vector<16x128xi32>
      %c0_i32_104 = arith.constant 0 : i32
      %314 = vector.broadcast %c0_i32_104 : i32 to vector<16x128xi32>
      %315 = arith.cmpi eq, %313, %314 : vector<16x128xi32>
      %cst_105 = arith.constant 0.000000e+00 : f32
      %cst_106 = arith.constant -1.000000e+06 : f32
      %316 = vector.broadcast %cst_105 : f32 to vector<16x128xf32>
      %317 = vector.broadcast %cst_106 : f32 to vector<16x128xf32>
      %318 = arith.select %315, %316, %317 : vector<16x128xi1>, vector<16x128xf32>
      %c0_107 = arith.constant 0 : index
      %c0_108 = arith.constant 0 : index
      %c0_109 = arith.constant 0 : index
      %319 = vector.load %arg7[%c0_107, %c0_108, %c0_109] : memref<3x16x128xf32, #tpu.memory_space<vmem>>, vector<1x16x128xf32>
      %320 = vector.shape_cast %319 : vector<1x16x128xf32> to vector<16x128xf32>
      %321 = vector.shape_cast %318 : vector<16x128xf32> to vector<1x16x128xf32>
      tpu.vector_store %arg7[%c0_107, %c0_108, %c0_109], %321 {strides = array<i32>} : memref<3x16x128xf32, #tpu.memory_space<vmem>>, vector<1x16x128xf32>,
      %cst_110 = arith.constant -1.000000e+06 : f32
      %322 = vector.broadcast %cst_110 : f32 to vector<16x128xf32>
      %c1_111 = arith.constant 1 : index
      %c0_112 = arith.constant 0 : index
      %c0_113 = arith.constant 0 : index
      %323 = vector.load %arg7[%c1_111, %c0_112, %c0_113] : memref<3x16x128xf32, #tpu.memory_space<vmem>>, vector<1x16x128xf32>
      %324 = vector.shape_cast %323 : vector<1x16x128xf32> to vector<16x128xf32>
      %325 = vector.shape_cast %322 : vector<16x128xf32> to vector<1x16x128xf32>
      tpu.vector_store %arg7[%c1_111, %c0_112, %c0_113], %325 {strides = array<i32>} : memref<3x16x128xf32, #tpu.memory_space<vmem>>, vector<1x16x128xf32>,
      %cst_114 = arith.constant -1.000000e+06 : f32
      %326 = vector.broadcast %cst_114 : f32 to vector<16x128xf32>
      %c2_115 = arith.constant 2 : index
      %c0_116 = arith.constant 0 : index
      %c0_117 = arith.constant 0 : index
      %327 = vector.load %arg7[%c2_115, %c0_116, %c0_117] : memref<3x16x128xf32, #tpu.memory_space<vmem>>, vector<1x16x128xf32>
      %328 = vector.shape_cast %327 : vector<1x16x128xf32> to vector<16x128xf32>
      %329 = vector.shape_cast %326 : vector<16x128xf32> to vector<1x16x128xf32>
      tpu.vector_store %arg7[%c2_115, %c0_116, %c0_117], %329 {strides = array<i32>} : memref<3x16x128xf32, #tpu.memory_space<vmem>>, vector<1x16x128xf32>,
      %c0_118 = arith.constant 0 : index
      %c0_119 = arith.constant 0 : index
      %330 = vector.load %arg8[%c0_118, %c0_119] : memref<16x128xf32, #tpu.memory_space<vmem>>, vector<16x128xf32>
      tpu.vector_store %arg8[%c0_118, %c0_119], %318 {strides = array<i32>} : memref<16x128xf32, #tpu.memory_space<vmem>>, vector<16x128xf32>,
    } else {
    }
    %c0 = arith.constant 0 : index
    %c0_1 = arith.constant 0 : index
    %3 = vector.load %arg4[%c0, %c0_1] : memref<128x128xf32, #tpu.memory_space<vmem>>, vector<128x128xf32>
    %c0_2 = arith.constant 0 : index
    %c0_3 = arith.constant 0 : index
    %c0_4 = arith.constant 0 : index
    %4 = vector.load %arg3[%c0_2, %c0_3, %c0_4] : memref<3x1x128xf32, #tpu.memory_space<vmem>>, vector<3x1x128xf32>
    %c0_5 = arith.constant 0 : index
    %c0_6 = arith.constant 0 : index
    %5 = vector.load %arg5[%c0_5, %c0_6] : memref<16x128xi32, #tpu.memory_space<vmem>>, vector<16x128xi32>
    %c0_7 = arith.constant 0 : index
    %c0_8 = arith.constant 0 : index
    %c0_9 = arith.constant 0 : index
    %6 = vector.load %arg7[%c0_7, %c0_8, %c0_9] : memref<3x16x128xf32, #tpu.memory_space<vmem>>, vector<1x16x128xf32>
    %7 = vector.shape_cast %6 : vector<1x16x128xf32> to vector<16x128xf32>
    %c1 = arith.constant 1 : index
    %c0_10 = arith.constant 0 : index
    %c0_11 = arith.constant 0 : index
    %8 = vector.load %arg7[%c1, %c0_10, %c0_11] : memref<3x16x128xf32, #tpu.memory_space<vmem>>, vector<1x16x128xf32>
    %9 = vector.shape_cast %8 : vector<1x16x128xf32> to vector<16x128xf32>
    %c2 = arith.constant 2 : index
    %c0_12 = arith.constant 0 : index
    %c0_13 = arith.constant 0 : index
    %10 = vector.load %arg7[%c2, %c0_12, %c0_13] : memref<3x16x128xf32, #tpu.memory_space<vmem>>, vector<1x16x128xf32>
    %11 = vector.shape_cast %10 : vector<1x16x128xf32> to vector<16x128xf32>
    %c0_14 = arith.constant 0 : index
    %c0_15 = arith.constant 0 : index
    %12 = vector.load %arg8[%c0_14, %c0_15] : memref<16x128xf32, #tpu.memory_space<vmem>>, vector<16x128xf32>
    %c8_i32 = arith.constant 8 : i32
    %13 = arith.muli %arg1, %c8_i32 : i32
    %c1_i32 = arith.constant 1 : i32
    %14 = arith.addi %13, %c1_i32 : i32
    %15 = vector.shape_cast %7 : vector<16x128xf32> to vector<1x16x128xf32>
    %16 = vector.shape_cast %9 : vector<16x128xf32> to vector<1x16x128xf32>
    %17 = vector.shape_cast %11 : vector<16x128xf32> to vector<1x16x128xf32>
    %18 = tpu.concatenate %15, %16, %17 in 0 : vector<1x16x128xf32>, vector<1x16x128xf32>, vector<1x16x128xf32> -> vector<3x16x128xf32>
    %cst = arith.constant dense<0xFF800000> : vector<3x16xf32>
    %19 = vector.multi_reduction <maximumf>, %18, %cst [2] : vector<3x16x128xf32> to vector<3x16xf32>
    %20 = vector.shape_cast %19 : vector<3x16xf32> to vector<3x16x1xf32>
    %21 = vector.broadcast %20 : vector<3x16x1xf32> to vector<3x16x128xf32>
    %22 = arith.subf %18, %21 : vector<3x16x128xf32>
    %23 = math.exp %22 : vector<3x16x128xf32>
    %24 = vector.shape_cast %23 : vector<3x16x128xf32> to vector<48x128xf32>
    %cst_16 = arith.constant dense<0.000000e+00> : vector<48x128xf32>
    %25 = tpu.matmul %24, %3, %cst_16 {dimension_numbers = #tpu.dot_dimension_numbers<[1], [0], [0], [1], [0, 0, 1, 1], [], []>} : vector<48x128xf32>, vector<128x128xf32>, vector<48x128xf32> -> vector<48x128xf32>
    %26 = vector.shape_cast %25 : vector<48x128xf32> to vector<3x16x128xf32>
    %27 = vector.broadcast %20 : vector<3x16x1xf32> to vector<3x16x128xf32>
    %28 = vector.broadcast %4 : vector<3x1x128xf32> to vector<3x16x128xf32>
    %29 = arith.addf %27, %28 : vector<3x16x128xf32>
    %c0_17 = arith.constant 0 : index
    %c0_18 = arith.constant 0 : index
    %c0_19 = arith.constant 0 : index
    %c0_20 = arith.constant 0 : index
    %30 = vector.load %arg2[%c0_17, %c0_18, %c0_19, %c0_20] : memref<8x3x16x128xbf16, #tpu.memory_space<vmem>>, vector<1x3x16x128xbf16>
    %31 = vector.shape_cast %30 : vector<1x3x16x128xbf16> to vector<3x16x128xbf16>
    %32 = arith.extf %31 : vector<3x16x128xbf16> to vector<3x16x128xf32>
    %33 = arith.addf %29, %32 : vector<3x16x128xf32>
    %cst_21 = arith.constant dense<0xFF800000> : vector<16x128xf32>
    %34 = vector.multi_reduction <maximumf>, %33, %cst_21 [0] : vector<3x16x128xf32> to vector<16x128xf32>
    %cst_22 = arith.constant 2.07944155 : f32
    %35 = vector.broadcast %cst_22 : f32 to vector<16x128xf32>
    %36 = arith.addf %34, %35 : vector<16x128xf32>
    %37 = vector.shape_cast %36 : vector<16x128xf32> to vector<1x16x128xf32>
    %38 = vector.broadcast %37 : vector<1x16x128xf32> to vector<3x16x128xf32>
    %39 = arith.subf %33, %38 : vector<3x16x128xf32>
    %40 = math.exp %39 : vector<3x16x128xf32>
    %41 = arith.mulf %26, %40 : vector<3x16x128xf32>
    %cst_23 = arith.constant dense<0.000000e+00> : vector<16x128xf32>
    %42 = vector.multi_reduction <add>, %41, %cst_23 [0] : vector<3x16x128xf32> to vector<16x128xf32>
    %cst_24 = arith.constant 9.99999935E-39 : f32
    %43 = vector.broadcast %cst_24 : f32 to vector<16x128xf32>
    %44 = arith.addf %42, %43 : vector<16x128xf32>
    %45 = math.log %44 : vector<16x128xf32>
    %46 = arith.addf %36, %45 : vector<16x128xf32>
    %47 = vector.broadcast %14 : i32 to vector<16x128xi32>
    %48 = arith.cmpi eq, %5, %47 : vector<16x128xi32>
    %49 = arith.select %48, %46, %12 : vector<16x128xi1>, vector<16x128xf32>
    %c2_i32 = arith.constant 2 : i32
    %50 = arith.addi %13, %c2_i32 : i32
    %51 = vector.shape_cast %46 : vector<16x128xf32> to vector<1x16x128xf32>
    %52 = vector.shape_cast %7 : vector<16x128xf32> to vector<1x16x128xf32>
    %53 = vector.shape_cast %9 : vector<16x128xf32> to vector<1x16x128xf32>
    %54 = tpu.concatenate %51, %52, %53 in 0 : vector<1x16x128xf32>, vector<1x16x128xf32>, vector<1x16x128xf32> -> vector<3x16x128xf32>
    %cst_25 = arith.constant dense<0xFF800000> : vector<3x16xf32>
    %55 = vector.multi_reduction <maximumf>, %54, %cst_25 [2] : vector<3x16x128xf32> to vector<3x16xf32>
    %56 = vector.shape_cast %55 : vector<3x16xf32> to vector<3x16x1xf32>
    %57 = vector.broadcast %56 : vector<3x16x1xf32> to vector<3x16x128xf32>
    %58 = arith.subf %54, %57 : vector<3x16x128xf32>
    %59 = math.exp %58 : vector<3x16x128xf32>
    %60 = vector.shape_cast %59 : vector<3x16x128xf32> to vector<48x128xf32>
    %cst_26 = arith.constant dense<0.000000e+00> : vector<48x128xf32>
    %61 = tpu.matmul %60, %3, %cst_26 {dimension_numbers = #tpu.dot_dimension_numbers<[1], [0], [0], [1], [0, 0, 1, 1], [], []>} : vector<48x128xf32>, vector<128x128xf32>, vector<48x128xf32> -> vector<48x128xf32>
    %62 = vector.shape_cast %61 : vector<48x128xf32> to vector<3x16x128xf32>
    %63 = vector.broadcast %56 : vector<3x16x1xf32> to vector<3x16x128xf32>
    %64 = vector.broadcast %4 : vector<3x1x128xf32> to vector<3x16x128xf32>
    %65 = arith.addf %63, %64 : vector<3x16x128xf32>
    %c1_27 = arith.constant 1 : index
    %c0_28 = arith.constant 0 : index
    %c0_29 = arith.constant 0 : index
    %c0_30 = arith.constant 0 : index
    %66 = vector.load %arg2[%c1_27, %c0_28, %c0_29, %c0_30] : memref<8x3x16x128xbf16, #tpu.memory_space<vmem>>, vector<1x3x16x128xbf16>
    %67 = vector.shape_cast %66 : vector<1x3x16x128xbf16> to vector<3x16x128xbf16>
    %68 = arith.extf %67 : vector<3x16x128xbf16> to vector<3x16x128xf32>
    %69 = arith.addf %65, %68 : vector<3x16x128xf32>
    %cst_31 = arith.constant dense<0xFF800000> : vector<16x128xf32>
    %70 = vector.multi_reduction <maximumf>, %69, %cst_31 [0] : vector<3x16x128xf32> to vector<16x128xf32>
    %cst_32 = arith.constant 2.07944155 : f32
    %71 = vector.broadcast %cst_32 : f32 to vector<16x128xf32>
    %72 = arith.addf %70, %71 : vector<16x128xf32>
    %73 = vector.shape_cast %72 : vector<16x128xf32> to vector<1x16x128xf32>
    %74 = vector.broadcast %73 : vector<1x16x128xf32> to vector<3x16x128xf32>
    %75 = arith.subf %69, %74 : vector<3x16x128xf32>
    %76 = math.exp %75 : vector<3x16x128xf32>
    %77 = arith.mulf %62, %76 : vector<3x16x128xf32>
    %cst_33 = arith.constant dense<0.000000e+00> : vector<16x128xf32>
    %78 = vector.multi_reduction <add>, %77, %cst_33 [0] : vector<3x16x128xf32> to vector<16x128xf32>
    %cst_34 = arith.constant 9.99999935E-39 : f32
    %79 = vector.broadcast %cst_34 : f32 to vector<16x128xf32>
    %80 = arith.addf %78, %79 : vector<16x128xf32>
    %81 = math.log %80 : vector<16x128xf32>
    %82 = arith.addf %72, %81 : vector<16x128xf32>
    %83 = vector.broadcast %50 : i32 to vector<16x128xi32>
    %84 = arith.cmpi eq, %5, %83 : vector<16x128xi32>
    %85 = arith.select %84, %82, %49 : vector<16x128xi1>, vector<16x128xf32>
    %c3_i32 = arith.constant 3 : i32
    %86 = arith.addi %13, %c3_i32 : i32
    %87 = vector.shape_cast %82 : vector<16x128xf32> to vector<1x16x128xf32>
    %88 = vector.shape_cast %46 : vector<16x128xf32> to vector<1x16x128xf32>
    %89 = vector.shape_cast %7 : vector<16x128xf32> to vector<1x16x128xf32>
    %90 = tpu.concatenate %87, %88, %89 in 0 : vector<1x16x128xf32>, vector<1x16x128xf32>, vector<1x16x128xf32> -> vector<3x16x128xf32>
    %cst_35 = arith.constant dense<0xFF800000> : vector<3x16xf32>
    %91 = vector.multi_reduction <maximumf>, %90, %cst_35 [2] : vector<3x16x128xf32> to vector<3x16xf32>
    %92 = vector.shape_cast %91 : vector<3x16xf32> to vector<3x16x1xf32>
    %93 = vector.broadcast %92 : vector<3x16x1xf32> to vector<3x16x128xf32>
    %94 = arith.subf %90, %93 : vector<3x16x128xf32>
    %95 = math.exp %94 : vector<3x16x128xf32>
    %96 = vector.shape_cast %95 : vector<3x16x128xf32> to vector<48x128xf32>
    %cst_36 = arith.constant dense<0.000000e+00> : vector<48x128xf32>
    %97 = tpu.matmul %96, %3, %cst_36 {dimension_numbers = #tpu.dot_dimension_numbers<[1], [0], [0], [1], [0, 0, 1, 1], [], []>} : vector<48x128xf32>, vector<128x128xf32>, vector<48x128xf32> -> vector<48x128xf32>
    %98 = vector.shape_cast %97 : vector<48x128xf32> to vector<3x16x128xf32>
    %99 = vector.broadcast %92 : vector<3x16x1xf32> to vector<3x16x128xf32>
    %100 = vector.broadcast %4 : vector<3x1x128xf32> to vector<3x16x128xf32>
    %101 = arith.addf %99, %100 : vector<3x16x128xf32>
    %c2_37 = arith.constant 2 : index
    %c0_38 = arith.constant 0 : index
    %c0_39 = arith.constant 0 : index
    %c0_40 = arith.constant 0 : index
    %102 = vector.load %arg2[%c2_37, %c0_38, %c0_39, %c0_40] : memref<8x3x16x128xbf16, #tpu.memory_space<vmem>>, vector<1x3x16x128xbf16>
    %103 = vector.shape_cast %102 : vector<1x3x16x128xbf16> to vector<3x16x128xbf16>
    %104 = arith.extf %103 : vector<3x16x128xbf16> to vector<3x16x128xf32>
    %105 = arith.addf %101, %104 : vector<3x16x128xf32>
    %cst_41 = arith.constant dense<0xFF800000> : vector<16x128xf32>
    %106 = vector.multi_reduction <maximumf>, %105, %cst_41 [0] : vector<3x16x128xf32> to vector<16x128xf32>
    %cst_42 = arith.constant 2.07944155 : f32
    %107 = vector.broadcast %cst_42 : f32 to vector<16x128xf32>
    %108 = arith.addf %106, %107 : vector<16x128xf32>
    %109 = vector.shape_cast %108 : vector<16x128xf32> to vector<1x16x128xf32>
    %110 = vector.broadcast %109 : vector<1x16x128xf32> to vector<3x16x128xf32>
    %111 = arith.subf %105, %110 : vector<3x16x128xf32>
    %112 = math.exp %111 : vector<3x16x128xf32>
    %113 = arith.mulf %98, %112 : vector<3x16x128xf32>
    %cst_43 = arith.constant dense<0.000000e+00> : vector<16x128xf32>
    %114 = vector.multi_reduction <add>, %113, %cst_43 [0] : vector<3x16x128xf32> to vector<16x128xf32>
    %cst_44 = arith.constant 9.99999935E-39 : f32
    %115 = vector.broadcast %cst_44 : f32 to vector<16x128xf32>
    %116 = arith.addf %114, %115 : vector<16x128xf32>
    %117 = math.log %116 : vector<16x128xf32>
    %118 = arith.addf %108, %117 : vector<16x128xf32>
    %119 = vector.broadcast %86 : i32 to vector<16x128xi32>
    %120 = arith.cmpi eq, %5, %119 : vector<16x128xi32>
    %121 = arith.select %120, %118, %85 : vector<16x128xi1>, vector<16x128xf32>
    %c4_i32 = arith.constant 4 : i32
    %122 = arith.addi %13, %c4_i32 : i32
    %123 = vector.shape_cast %118 : vector<16x128xf32> to vector<1x16x128xf32>
    %124 = vector.shape_cast %82 : vector<16x128xf32> to vector<1x16x128xf32>
    %125 = vector.shape_cast %46 : vector<16x128xf32> to vector<1x16x128xf32>
    %126 = tpu.concatenate %123, %124, %125 in 0 : vector<1x16x128xf32>, vector<1x16x128xf32>, vector<1x16x128xf32> -> vector<3x16x128xf32>
    %cst_45 = arith.constant dense<0xFF800000> : vector<3x16xf32>
    %127 = vector.multi_reduction <maximumf>, %126, %cst_45 [2] : vector<3x16x128xf32> to vector<3x16xf32>
    %128 = vector.shape_cast %127 : vector<3x16xf32> to vector<3x16x1xf32>
    %129 = vector.broadcast %128 : vector<3x16x1xf32> to vector<3x16x128xf32>
    %130 = arith.subf %126, %129 : vector<3x16x128xf32>
    %131 = math.exp %130 : vector<3x16x128xf32>
    %132 = vector.shape_cast %131 : vector<3x16x128xf32> to vector<48x128xf32>
    %cst_46 = arith.constant dense<0.000000e+00> : vector<48x128xf32>
    %133 = tpu.matmul %132, %3, %cst_46 {dimension_numbers = #tpu.dot_dimension_numbers<[1], [0], [0], [1], [0, 0, 1, 1], [], []>} : vector<48x128xf32>, vector<128x128xf32>, vector<48x128xf32> -> vector<48x128xf32>
    %134 = vector.shape_cast %133 : vector<48x128xf32> to vector<3x16x128xf32>
    %135 = vector.broadcast %128 : vector<3x16x1xf32> to vector<3x16x128xf32>
    %136 = vector.broadcast %4 : vector<3x1x128xf32> to vector<3x16x128xf32>
    %137 = arith.addf %135, %136 : vector<3x16x128xf32>
    %c3 = arith.constant 3 : index
    %c0_47 = arith.constant 0 : index
    %c0_48 = arith.constant 0 : index
    %c0_49 = arith.constant 0 : index
    %138 = vector.load %arg2[%c3, %c0_47, %c0_48, %c0_49] : memref<8x3x16x128xbf16, #tpu.memory_space<vmem>>, vector<1x3x16x128xbf16>
    %139 = vector.shape_cast %138 : vector<1x3x16x128xbf16> to vector<3x16x128xbf16>
    %140 = arith.extf %139 : vector<3x16x128xbf16> to vector<3x16x128xf32>
    %141 = arith.addf %137, %140 : vector<3x16x128xf32>
    %cst_50 = arith.constant dense<0xFF800000> : vector<16x128xf32>
    %142 = vector.multi_reduction <maximumf>, %141, %cst_50 [0] : vector<3x16x128xf32> to vector<16x128xf32>
    %cst_51 = arith.constant 2.07944155 : f32
    %143 = vector.broadcast %cst_51 : f32 to vector<16x128xf32>
    %144 = arith.addf %142, %143 : vector<16x128xf32>
    %145 = vector.shape_cast %144 : vector<16x128xf32> to vector<1x16x128xf32>
    %146 = vector.broadcast %145 : vector<1x16x128xf32> to vector<3x16x128xf32>
    %147 = arith.subf %141, %146 : vector<3x16x128xf32>
    %148 = math.exp %147 : vector<3x16x128xf32>
    %149 = arith.mulf %134, %148 : vector<3x16x128xf32>
    %cst_52 = arith.constant dense<0.000000e+00> : vector<16x128xf32>
    %150 = vector.multi_reduction <add>, %149, %cst_52 [0] : vector<3x16x128xf32> to vector<16x128xf32>
    %cst_53 = arith.constant 9.99999935E-39 : f32
    %151 = vector.broadcast %cst_53 : f32 to vector<16x128xf32>
    %152 = arith.addf %150, %151 : vector<16x128xf32>
    %153 = math.log %152 : vector<16x128xf32>
    %154 = arith.addf %144, %153 : vector<16x128xf32>
    %155 = vector.broadcast %122 : i32 to vector<16x128xi32>
    %156 = arith.cmpi eq, %5, %155 : vector<16x128xi32>
    %157 = arith.select %156, %154, %121 : vector<16x128xi1>, vector<16x128xf32>
    %c5_i32 = arith.constant 5 : i32
    %158 = arith.addi %13, %c5_i32 : i32
    %159 = vector.shape_cast %154 : vector<16x128xf32> to vector<1x16x128xf32>
    %160 = vector.shape_cast %118 : vector<16x128xf32> to vector<1x16x128xf32>
    %161 = vector.shape_cast %82 : vector<16x128xf32> to vector<1x16x128xf32>
    %162 = tpu.concatenate %159, %160, %161 in 0 : vector<1x16x128xf32>, vector<1x16x128xf32>, vector<1x16x128xf32> -> vector<3x16x128xf32>
    %cst_54 = arith.constant dense<0xFF800000> : vector<3x16xf32>
    %163 = vector.multi_reduction <maximumf>, %162, %cst_54 [2] : vector<3x16x128xf32> to vector<3x16xf32>
    %164 = vector.shape_cast %163 : vector<3x16xf32> to vector<3x16x1xf32>
    %165 = vector.broadcast %164 : vector<3x16x1xf32> to vector<3x16x128xf32>
    %166 = arith.subf %162, %165 : vector<3x16x128xf32>
    %167 = math.exp %166 : vector<3x16x128xf32>
    %168 = vector.shape_cast %167 : vector<3x16x128xf32> to vector<48x128xf32>
    %cst_55 = arith.constant dense<0.000000e+00> : vector<48x128xf32>
    %169 = tpu.matmul %168, %3, %cst_55 {dimension_numbers = #tpu.dot_dimension_numbers<[1], [0], [0], [1], [0, 0, 1, 1], [], []>} : vector<48x128xf32>, vector<128x128xf32>, vector<48x128xf32> -> vector<48x128xf32>
    %170 = vector.shape_cast %169 : vector<48x128xf32> to vector<3x16x128xf32>
    %171 = vector.broadcast %164 : vector<3x16x1xf32> to vector<3x16x128xf32>
    %172 = vector.broadcast %4 : vector<3x1x128xf32> to vector<3x16x128xf32>
    %173 = arith.addf %171, %172 : vector<3x16x128xf32>
    %c4 = arith.constant 4 : index
    %c0_56 = arith.constant 0 : index
    %c0_57 = arith.constant 0 : index
    %c0_58 = arith.constant 0 : index
    %174 = vector.load %arg2[%c4, %c0_56, %c0_57, %c0_58] : memref<8x3x16x128xbf16, #tpu.memory_space<vmem>>, vector<1x3x16x128xbf16>
    %175 = vector.shape_cast %174 : vector<1x3x16x128xbf16> to vector<3x16x128xbf16>
    %176 = arith.extf %175 : vector<3x16x128xbf16> to vector<3x16x128xf32>
    %177 = arith.addf %173, %176 : vector<3x16x128xf32>
    %cst_59 = arith.constant dense<0xFF800000> : vector<16x128xf32>
    %178 = vector.multi_reduction <maximumf>, %177, %cst_59 [0] : vector<3x16x128xf32> to vector<16x128xf32>
    %cst_60 = arith.constant 2.07944155 : f32
    %179 = vector.broadcast %cst_60 : f32 to vector<16x128xf32>
    %180 = arith.addf %178, %179 : vector<16x128xf32>
    %181 = vector.shape_cast %180 : vector<16x128xf32> to vector<1x16x128xf32>
    %182 = vector.broadcast %181 : vector<1x16x128xf32> to vector<3x16x128xf32>
    %183 = arith.subf %177, %182 : vector<3x16x128xf32>
    %184 = math.exp %183 : vector<3x16x128xf32>
    %185 = arith.mulf %170, %184 : vector<3x16x128xf32>
    %cst_61 = arith.constant dense<0.000000e+00> : vector<16x128xf32>
    %186 = vector.multi_reduction <add>, %185, %cst_61 [0] : vector<3x16x128xf32> to vector<16x128xf32>
    %cst_62 = arith.constant 9.99999935E-39 : f32
    %187 = vector.broadcast %cst_62 : f32 to vector<16x128xf32>
    %188 = arith.addf %186, %187 : vector<16x128xf32>
    %189 = math.log %188 : vector<16x128xf32>
    %190 = arith.addf %180, %189 : vector<16x128xf32>
    %191 = vector.broadcast %158 : i32 to vector<16x128xi32>
    %192 = arith.cmpi eq, %5, %191 : vector<16x128xi32>
    %193 = arith.select %192, %190, %157 : vector<16x128xi1>, vector<16x128xf32>
    %c6_i32 = arith.constant 6 : i32
    %194 = arith.addi %13, %c6_i32 : i32
    %195 = vector.shape_cast %190 : vector<16x128xf32> to vector<1x16x128xf32>
    %196 = vector.shape_cast %154 : vector<16x128xf32> to vector<1x16x128xf32>
    %197 = vector.shape_cast %118 : vector<16x128xf32> to vector<1x16x128xf32>
    %198 = tpu.concatenate %195, %196, %197 in 0 : vector<1x16x128xf32>, vector<1x16x128xf32>, vector<1x16x128xf32> -> vector<3x16x128xf32>
    %cst_63 = arith.constant dense<0xFF800000> : vector<3x16xf32>
    %199 = vector.multi_reduction <maximumf>, %198, %cst_63 [2] : vector<3x16x128xf32> to vector<3x16xf32>
    %200 = vector.shape_cast %199 : vector<3x16xf32> to vector<3x16x1xf32>
    %201 = vector.broadcast %200 : vector<3x16x1xf32> to vector<3x16x128xf32>
    %202 = arith.subf %198, %201 : vector<3x16x128xf32>
    %203 = math.exp %202 : vector<3x16x128xf32>
    %204 = vector.shape_cast %203 : vector<3x16x128xf32> to vector<48x128xf32>
    %cst_64 = arith.constant dense<0.000000e+00> : vector<48x128xf32>
    %205 = tpu.matmul %204, %3, %cst_64 {dimension_numbers = #tpu.dot_dimension_numbers<[1], [0], [0], [1], [0, 0, 1, 1], [], []>} : vector<48x128xf32>, vector<128x128xf32>, vector<48x128xf32> -> vector<48x128xf32>
    %206 = vector.shape_cast %205 : vector<48x128xf32> to vector<3x16x128xf32>
    %207 = vector.broadcast %200 : vector<3x16x1xf32> to vector<3x16x128xf32>
    %208 = vector.broadcast %4 : vector<3x1x128xf32> to vector<3x16x128xf32>
    %209 = arith.addf %207, %208 : vector<3x16x128xf32>
    %c5 = arith.constant 5 : index
    %c0_65 = arith.constant 0 : index
    %c0_66 = arith.constant 0 : index
    %c0_67 = arith.constant 0 : index
    %210 = vector.load %arg2[%c5, %c0_65, %c0_66, %c0_67] : memref<8x3x16x128xbf16, #tpu.memory_space<vmem>>, vector<1x3x16x128xbf16>
    %211 = vector.shape_cast %210 : vector<1x3x16x128xbf16> to vector<3x16x128xbf16>
    %212 = arith.extf %211 : vector<3x16x128xbf16> to vector<3x16x128xf32>
    %213 = arith.addf %209, %212 : vector<3x16x128xf32>
    %cst_68 = arith.constant dense<0xFF800000> : vector<16x128xf32>
    %214 = vector.multi_reduction <maximumf>, %213, %cst_68 [0] : vector<3x16x128xf32> to vector<16x128xf32>
    %cst_69 = arith.constant 2.07944155 : f32
    %215 = vector.broadcast %cst_69 : f32 to vector<16x128xf32>
    %216 = arith.addf %214, %215 : vector<16x128xf32>
    %217 = vector.shape_cast %216 : vector<16x128xf32> to vector<1x16x128xf32>
    %218 = vector.broadcast %217 : vector<1x16x128xf32> to vector<3x16x128xf32>
    %219 = arith.subf %213, %218 : vector<3x16x128xf32>
    %220 = math.exp %219 : vector<3x16x128xf32>
    %221 = arith.mulf %206, %220 : vector<3x16x128xf32>
    %cst_70 = arith.constant dense<0.000000e+00> : vector<16x128xf32>
    %222 = vector.multi_reduction <add>, %221, %cst_70 [0] : vector<3x16x128xf32> to vector<16x128xf32>
    %cst_71 = arith.constant 9.99999935E-39 : f32
    %223 = vector.broadcast %cst_71 : f32 to vector<16x128xf32>
    %224 = arith.addf %222, %223 : vector<16x128xf32>
    %225 = math.log %224 : vector<16x128xf32>
    %226 = arith.addf %216, %225 : vector<16x128xf32>
    %227 = vector.broadcast %194 : i32 to vector<16x128xi32>
    %228 = arith.cmpi eq, %5, %227 : vector<16x128xi32>
    %229 = arith.select %228, %226, %193 : vector<16x128xi1>, vector<16x128xf32>
    %c7_i32 = arith.constant 7 : i32
    %230 = arith.addi %13, %c7_i32 : i32
    %231 = vector.shape_cast %226 : vector<16x128xf32> to vector<1x16x128xf32>
    %232 = vector.shape_cast %190 : vector<16x128xf32> to vector<1x16x128xf32>
    %233 = vector.shape_cast %154 : vector<16x128xf32> to vector<1x16x128xf32>
    %234 = tpu.concatenate %231, %232, %233 in 0 : vector<1x16x128xf32>, vector<1x16x128xf32>, vector<1x16x128xf32> -> vector<3x16x128xf32>
    %cst_72 = arith.constant dense<0xFF800000> : vector<3x16xf32>
    %235 = vector.multi_reduction <maximumf>, %234, %cst_72 [2] : vector<3x16x128xf32> to vector<3x16xf32>
    %236 = vector.shape_cast %235 : vector<3x16xf32> to vector<3x16x1xf32>
    %237 = vector.broadcast %236 : vector<3x16x1xf32> to vector<3x16x128xf32>
    %238 = arith.subf %234, %237 : vector<3x16x128xf32>
    %239 = math.exp %238 : vector<3x16x128xf32>
    %240 = vector.shape_cast %239 : vector<3x16x128xf32> to vector<48x128xf32>
    %cst_73 = arith.constant dense<0.000000e+00> : vector<48x128xf32>
    %241 = tpu.matmul %240, %3, %cst_73 {dimension_numbers = #tpu.dot_dimension_numbers<[1], [0], [0], [1], [0, 0, 1, 1], [], []>} : vector<48x128xf32>, vector<128x128xf32>, vector<48x128xf32> -> vector<48x128xf32>
    %242 = vector.shape_cast %241 : vector<48x128xf32> to vector<3x16x128xf32>
    %243 = vector.broadcast %236 : vector<3x16x1xf32> to vector<3x16x128xf32>
    %244 = vector.broadcast %4 : vector<3x1x128xf32> to vector<3x16x128xf32>
    %245 = arith.addf %243, %244 : vector<3x16x128xf32>
    %c6 = arith.constant 6 : index
    %c0_74 = arith.constant 0 : index
    %c0_75 = arith.constant 0 : index
    %c0_76 = arith.constant 0 : index
    %246 = vector.load %arg2[%c6, %c0_74, %c0_75, %c0_76] : memref<8x3x16x128xbf16, #tpu.memory_space<vmem>>, vector<1x3x16x128xbf16>
    %247 = vector.shape_cast %246 : vector<1x3x16x128xbf16> to vector<3x16x128xbf16>
    %248 = arith.extf %247 : vector<3x16x128xbf16> to vector<3x16x128xf32>
    %249 = arith.addf %245, %248 : vector<3x16x128xf32>
    %cst_77 = arith.constant dense<0xFF800000> : vector<16x128xf32>
    %250 = vector.multi_reduction <maximumf>, %249, %cst_77 [0] : vector<3x16x128xf32> to vector<16x128xf32>
    %cst_78 = arith.constant 2.07944155 : f32
    %251 = vector.broadcast %cst_78 : f32 to vector<16x128xf32>
    %252 = arith.addf %250, %251 : vector<16x128xf32>
    %253 = vector.shape_cast %252 : vector<16x128xf32> to vector<1x16x128xf32>
    %254 = vector.broadcast %253 : vector<1x16x128xf32> to vector<3x16x128xf32>
    %255 = arith.subf %249, %254 : vector<3x16x128xf32>
    %256 = math.exp %255 : vector<3x16x128xf32>
    %257 = arith.mulf %242, %256 : vector<3x16x128xf32>
    %cst_79 = arith.constant dense<0.000000e+00> : vector<16x128xf32>
    %258 = vector.multi_reduction <add>, %257, %cst_79 [0] : vector<3x16x128xf32> to vector<16x128xf32>
    %cst_80 = arith.constant 9.99999935E-39 : f32
    %259 = vector.broadcast %cst_80 : f32 to vector<16x128xf32>
    %260 = arith.addf %258, %259 : vector<16x128xf32>
    %261 = math.log %260 : vector<16x128xf32>
    %262 = arith.addf %252, %261 : vector<16x128xf32>
    %263 = vector.broadcast %230 : i32 to vector<16x128xi32>
    %264 = arith.cmpi eq, %5, %263 : vector<16x128xi32>
    %265 = arith.select %264, %262, %229 : vector<16x128xi1>, vector<16x128xf32>
    %c8_i32_81 = arith.constant 8 : i32
    %266 = arith.addi %13, %c8_i32_81 : i32
    %267 = vector.shape_cast %262 : vector<16x128xf32> to vector<1x16x128xf32>
    %268 = vector.shape_cast %226 : vector<16x128xf32> to vector<1x16x128xf32>
    %269 = vector.shape_cast %190 : vector<16x128xf32> to vector<1x16x128xf32>
    %270 = tpu.concatenate %267, %268, %269 in 0 : vector<1x16x128xf32>, vector<1x16x128xf32>, vector<1x16x128xf32> -> vector<3x16x128xf32>
    %cst_82 = arith.constant dense<0xFF800000> : vector<3x16xf32>
    %271 = vector.multi_reduction <maximumf>, %270, %cst_82 [2] : vector<3x16x128xf32> to vector<3x16xf32>
    %272 = vector.shape_cast %271 : vector<3x16xf32> to vector<3x16x1xf32>
    %273 = vector.broadcast %272 : vector<3x16x1xf32> to vector<3x16x128xf32>
    %274 = arith.subf %270, %273 : vector<3x16x128xf32>
    %275 = math.exp %274 : vector<3x16x128xf32>
    %276 = vector.shape_cast %275 : vector<3x16x128xf32> to vector<48x128xf32>
    %cst_83 = arith.constant dense<0.000000e+00> : vector<48x128xf32>
    %277 = tpu.matmul %276, %3, %cst_83 {dimension_numbers = #tpu.dot_dimension_numbers<[1], [0], [0], [1], [0, 0, 1, 1], [], []>} : vector<48x128xf32>, vector<128x128xf32>, vector<48x128xf32> -> vector<48x128xf32>
    %278 = vector.shape_cast %277 : vector<48x128xf32> to vector<3x16x128xf32>
    %279 = vector.broadcast %272 : vector<3x16x1xf32> to vector<3x16x128xf32>
    %280 = vector.broadcast %4 : vector<3x1x128xf32> to vector<3x16x128xf32>
    %281 = arith.addf %279, %280 : vector<3x16x128xf32>
    %c7 = arith.constant 7 : index
    %c0_84 = arith.constant 0 : index
    %c0_85 = arith.constant 0 : index
    %c0_86 = arith.constant 0 : index
    %282 = vector.load %arg2[%c7, %c0_84, %c0_85, %c0_86] : memref<8x3x16x128xbf16, #tpu.memory_space<vmem>>, vector<1x3x16x128xbf16>
    %283 = vector.shape_cast %282 : vector<1x3x16x128xbf16> to vector<3x16x128xbf16>
    %284 = arith.extf %283 : vector<3x16x128xbf16> to vector<3x16x128xf32>
    %285 = arith.addf %281, %284 : vector<3x16x128xf32>
    %cst_87 = arith.constant dense<0xFF800000> : vector<16x128xf32>
    %286 = vector.multi_reduction <maximumf>, %285, %cst_87 [0] : vector<3x16x128xf32> to vector<16x128xf32>
    %cst_88 = arith.constant 2.07944155 : f32
    %287 = vector.broadcast %cst_88 : f32 to vector<16x128xf32>
    %288 = arith.addf %286, %287 : vector<16x128xf32>
    %289 = vector.shape_cast %288 : vector<16x128xf32> to vector<1x16x128xf32>
    %290 = vector.broadcast %289 : vector<1x16x128xf32> to vector<3x16x128xf32>
    %291 = arith.subf %285, %290 : vector<3x16x128xf32>
    %292 = math.exp %291 : vector<3x16x128xf32>
    %293 = arith.mulf %278, %292 : vector<3x16x128xf32>
    %cst_89 = arith.constant dense<0.000000e+00> : vector<16x128xf32>
    %294 = vector.multi_reduction <add>, %293, %cst_89 [0] : vector<3x16x128xf32> to vector<16x128xf32>
    %cst_90 = arith.constant 9.99999935E-39 : f32
    %295 = vector.broadcast %cst_90 : f32 to vector<16x128xf32>
    %296 = arith.addf %294, %295 : vector<16x128xf32>
    %297 = math.log %296 : vector<16x128xf32>
    %298 = arith.addf %288, %297 : vector<16x128xf32>
    %299 = vector.broadcast %266 : i32 to vector<16x128xi32>
    %300 = arith.cmpi eq, %5, %299 : vector<16x128xi32>
    %301 = arith.select %300, %298, %265 : vector<16x128xi1>, vector<16x128xf32>
    %c0_91 = arith.constant 0 : index
    %c0_92 = arith.constant 0 : index
    %c0_93 = arith.constant 0 : index
    %302 = vector.load %arg7[%c0_91, %c0_92, %c0_93] : memref<3x16x128xf32, #tpu.memory_space<vmem>>, vector<1x16x128xf32>
    %303 = vector.shape_cast %302 : vector<1x16x128xf32> to vector<16x128xf32>
    %304 = vector.shape_cast %298 : vector<16x128xf32> to vector<1x16x128xf32>
    tpu.vector_store %arg7[%c0_91, %c0_92, %c0_93], %304 {strides = array<i32>} : memref<3x16x128xf32, #tpu.memory_space<vmem>>, vector<1x16x128xf32>,
    %c1_94 = arith.constant 1 : index
    %c0_95 = arith.constant 0 : index
    %c0_96 = arith.constant 0 : index
    %305 = vector.load %arg7[%c1_94, %c0_95, %c0_96] : memref<3x16x128xf32, #tpu.memory_space<vmem>>, vector<1x16x128xf32>
    %306 = vector.shape_cast %305 : vector<1x16x128xf32> to vector<16x128xf32>
    %307 = vector.shape_cast %262 : vector<16x128xf32> to vector<1x16x128xf32>
    tpu.vector_store %arg7[%c1_94, %c0_95, %c0_96], %307 {strides = array<i32>} : memref<3x16x128xf32, #tpu.memory_space<vmem>>, vector<1x16x128xf32>,
    %c2_97 = arith.constant 2 : index
    %c0_98 = arith.constant 0 : index
    %c0_99 = arith.constant 0 : index
    %308 = vector.load %arg7[%c2_97, %c0_98, %c0_99] : memref<3x16x128xf32, #tpu.memory_space<vmem>>, vector<1x16x128xf32>
    %309 = vector.shape_cast %308 : vector<1x16x128xf32> to vector<16x128xf32>
    %310 = vector.shape_cast %226 : vector<16x128xf32> to vector<1x16x128xf32>
    tpu.vector_store %arg7[%c2_97, %c0_98, %c0_99], %310 {strides = array<i32>} : memref<3x16x128xf32, #tpu.memory_space<vmem>>, vector<1x16x128xf32>,
    %c0_100 = arith.constant 0 : index
    %c0_101 = arith.constant 0 : index
    %311 = vector.load %arg8[%c0_100, %c0_101] : memref<16x128xf32, #tpu.memory_space<vmem>>, vector<16x128xf32>
    tpu.vector_store %arg8[%c0_100, %c0_101], %301 {strides = array<i32>} : memref<16x128xf32, #tpu.memory_space<vmem>>, vector<16x128xf32>,
    %c0_102 = arith.constant 0 : index
    %c0_103 = arith.constant 0 : index
    %312 = vector.load %arg6[%c0_102, %c0_103] : memref<16x128xf32, #tpu.memory_space<vmem>>, vector<16x128xf32>
    tpu.vector_store %arg6[%c0_102, %c0_103], %301 {strides = array<i32>} : memref<16x128xf32, #tpu.memory_space<vmem>>, vector<16x128xf32>,
    return
  }
  func.func @transform_0(%arg0: i32, %arg1: i32) -> (i32, i32, i32, i32) {
    %c1_i32 = arith.constant 1 : i32
    %0 = arith.muli %arg0, %c1_i32 : i32
    %1 = arith.addi %0, %arg1 : i32
    %c0_i32 = arith.constant 0 : i32
    %c0_i32_0 = arith.constant 0 : i32
    %c0_i32_1 = arith.constant 0 : i32
    %c0_i32_2 = arith.constant 0 : i32
    return %1, %c0_i32, %c0_i32_0, %c0_i32_1 : i32, i32, i32, i32
  }
  func.func @transform_1(%arg0: i32, %arg1: i32) -> (i32, i32, i32) {
    %c0_i32 = arith.constant 0 : i32
    %c0_i32_0 = arith.constant 0 : i32
    %c0_i32_1 = arith.constant 0 : i32
    %c0_i32_2 = arith.constant 0 : i32
    return %c0_i32, %c0_i32_0, %c0_i32_1 : i32, i32, i32
  }
  func.func @transform_2(%arg0: i32, %arg1: i32) -> (i32, i32) {
    %c0_i32 = arith.constant 0 : i32
    %c0_i32_0 = arith.constant 0 : i32
    %c0_i32_1 = arith.constant 0 : i32
    return %c0_i32, %c0_i32_0 : i32, i32
  }
  func.func @transform_3(%arg0: i32, %arg1: i32) -> (i32, i32) {
    %c0_i32 = arith.constant 0 : i32
    %c0_i32_0 = arith.constant 0 : i32
    return %arg0, %c0_i32 : i32, i32
  }
  func.func @transform_4(%arg0: i32, %arg1: i32) -> (i32, i32) {
    %c0_i32 = arith.constant 0 : i32
    %c0_i32_0 = arith.constant 0 : i32
    return %arg0, %c0_i32 : i32, i32
  }
}

</mosaic_0001>

<bundles_post_ra>
// kernel: tpu_custom_call.1
= control target key start
LH: loop header
LB: loop body
LE: loop exit
PB: predicated region body
PF: predicated region fallthrough
CT: control target
= control target key end

     0   :  { %9 = vsyncpa [#allocation5], 0  ;;  %s3301_s0 = inlined_call_operand.hbm [shape: bf16[8,3,16,128], index: 0, kind: input, shape index: {}]   ;;  %s3302_s1 = inlined_call_operand.hbm [shape: f32[3,1,128], index: 1, kind: input, shape index: {}]   ;;  %s3303_s2 = inlined_call_operand.hbm [shape: f32[128,128], index: 2, kind: input, shape index: {}]   ;;  %s3304_s3 = inlined_call_operand.hbm [shape: s32[16,128], index: 3, kind: input, shape index: {}]   ;;  %s3305_s4 = inlined_call_operand.hbm [shape: f32[16,128], index: 4, kind: output, shape index: {}]  }
   0x1   :  { %10 = vsyncpa [#allocation8], 0 }
   0x2   :  { %11 = vsyncpa [#allocation11], 0 }
   0x3   :  { %12 = vsyncpa [#allocation6], 0  ;;  %s2546_s15 = smov [#allocation7]  }
   0x4   :  { %s35_s16 = sshll.u32 %s2546_s15, 4  ;;  %s36_s16 = int_to_ptr.vmem [resolvable:$true] %s35_s16 }
   0x5   :  { %s2446_s17 = scalar_lea.vmem %s36_s16, 48  ;;  %s2450_s18 = scalar_lea.vmem %s36_s16, 64 }
   0x6   :  { %p2447_p0 = scmp.ne.s32.totalorder %s36_s16, %s2446_s17  ;;  %p2451_p1 = scmp.lt.s32.totalorder %s36_s16, %s36_s16 }
   0x7   :  { %p2452_p2 = scmp.lt.s32.totalorder %s2450_s18, %s2446_s17 }
   0x9   :  { %p2453_p3 = por %p2452_p2, %p2451_p1 }
   0xb   :  { %p2454_p4 = pnand %p2453_p3, %p2447_p0 }
   0xd   :  { %2457 = shalt.err (!%p2454_p4)
}
   0xe   :  { %s2547_s19 = smov 16   ;;  %s2548_s20 = smov 1  }
   0xf   :  { %41 = dma.hbm_to_vmem [thread:$0]  %s3302_s1, 48, %s36_s16, [#allocation8], %s2547_s19, %s2547_s19, %s2548_s20  }
  0x10   :  { %s2549_s23 = smov [#allocation4]  }
  0x11   :  { %s23_s24 = sshll.u32 %s2549_s23, 4  ;;  %s24_s24 = int_to_ptr.vmem [resolvable:$true] %s23_s24 }
  0x12   :  { %s2466_s25 = scalar_lea.vmem %s24_s24, 3072  ;;  %p2471_p6 = scmp.lt.s32.totalorder %s24_s24, %s24_s24 }
  0x13   :  { %p2467_p5 = scmp.ne.s32.totalorder %s24_s24, %s2466_s25  ;;  %p2472_p7 = scmp.lt.s32.totalorder %s2466_s25, %s2466_s25 }
  0x15   :  { %p2473_p8 = por %p2472_p7, %p2471_p6 }
  0x17   :  { %p2474_p9 = pnand %p2473_p8, %p2467_p5 }
  0x19   :  { %2477 = shalt.err (!%p2474_p9)
}
  0x1a   :  { %s2550_s26 = smov 64   ;;  %s2551_s27 = smov 4  }
  0x1b   :  { %29 = dma.hbm_to_vmem [thread:$0]  %s3301_s0, 3072, %s24_s24, [#allocation5], %s2550_s26, %s2550_s26, %s2551_s27  }
  0x1c   :  { %s2552_s30 = smov [#allocation9]  }
  0x1d   :  { %s47_s5 = sshll.u32 %s2552_s30, 4  ;;  %s48_s5 = int_to_ptr.vmem [resolvable:$true] %s47_s5 }
  0x1e   :  { %s2486_s1 = scalar_lea.vmem %s48_s5, 2048  ;;  %p2491_p11 = scmp.lt.s32.totalorder %s48_s5, %s48_s5 }
  0x1f   :  { %p2487_p10 = scmp.ne.s32.totalorder %s48_s5, %s2486_s1  ;;  %p2492_p12 = scmp.lt.s32.totalorder %s2486_s1, %s2486_s1 }
  0x21   :  { %p2493_p13 = por %p2492_p12, %p2491_p11 }
  0x23   :  { %p2494_p0 = pnand %p2493_p13, %p2487_p10 }
  0x25   :  { %2497 = shalt.err (!%p2494_p0)
}
  0x26   :  { %s2553_s6 = smov 128   ;;  %s2554_s7 = smov 8  }
  0x27   :  { %53 = dma.hbm_to_vmem [thread:$0]  %s3303_s2, 2048, %s48_s5, [#allocation8], %s2553_s6, %s2553_s6, %s2554_s7  }
  0x28   :  { %s2555_s0 = smov [#allocation10]  }
  0x29   :  { %s59_s10 = sshll.u32 %s2555_s0, 4  ;;  %s60_s10 = int_to_ptr.vmem [resolvable:$true] %s59_s10 }
  0x2a   :  { %s2506_s11 = scalar_lea.vmem %s60_s10, 256  ;;  %p2511_p2 = scmp.lt.s32.totalorder %s60_s10, %s60_s10 }
  0x2b   :  { %p2507_p1 = scmp.ne.s32.totalorder %s60_s10, %s2506_s11  ;;  %p2512_p3 = scmp.lt.s32.totalorder %s2506_s11, %s2506_s11 }
  0x2d   :  { %p2513_p4 = por %p2512_p3, %p2511_p2 }
  0x2f   :  { %p2514_p5 = pnand %p2513_p4, %p2507_p1 }
  0x31   :  { %2517 = shalt.err (!%p2514_p5)
}
  0x32   :  { %65 = dma.hbm_to_vmem [thread:$0]  %s3304_s3, 256, %s60_s10, [#allocation11], %s2553_s6, %s2553_s6, %s2554_s7  }
  0x33   :  { %2538 = dma.done.wait [#allocation5], 3072  }
  0x34   :  { %2539 = vsyncadd [#allocation5], 4294964224 }
  0x35   :  { %2540 = dma.done.wait [#allocation8], 2096  }
  0x36   :  { %2541 = vsyncadd [#allocation8], 4294965200  ;;  %v84_v0 = vlaneseq }
  0x37   :  { %2542 = dma.done.wait [#allocation11], 256  }
  0x38   :  { %2543 = vsyncadd [#allocation11], 4294967040  ;;  %v2556_v1 = vmov -1000000.0   ;;  %v85_v2 = vand.u32 127, %v84_v0  ;;  %v2604_v4 = vld [vmem:[#allocation9 + $0x78] sm:$0xff] }
  0x39   :  { %135 = vmax.xlane.f32.xlu1 %v2556_v1  ;;  %v2606_v5 = vld [vmem:[#allocation9 + $0x70] sm:$0xff]  ;;  %1911 = vmatprep.subr.mxu0 %v2604_v4  ;;  %v2611_v6 = vld [vmem:[#allocation9 + $0x68] sm:$0xff]  ;;  %v2616_v7 = vld [vmem:[#allocation9 + $0x60] sm:$0xff]  ;;  %s2557_s2 = smov [#allocation12]  }
  0x3a   :  { %vm86_vm0 = vcmp.eq.s32.totalorder %v85_v2, 0  ;;  %1952 = vmatprep.subr.mxu1 %v2604_v4  ;;  %1912 = vmatpush3.msra.mxu0 %v2604_v4  ;;  %v2622_v8 = vld [vmem:[#allocation9 + $0x58] sm:$0xff]  ;;  %v2629_v9 = vld [vmem:[#allocation9 + $0x50] sm:$0xff]  ;;  %v2633_v10 = vld [vmem:[#allocation9 + $0x48] sm:$0xff]  ;;  %s1606_s3 = sshll.u32 %s2557_s2, 4  ;;  %s1607_s3 = int_to_ptr.vmem [resolvable:$true] %s1606_s3 }
  0x3b   :  { %v2601_v3 = vsel %vm86_vm0, 0.0, %v2556_v1  ;;  %1913 = vmatprep.subr.mxu0 %v2606_v5  ;;  %1953 = vmatpush3.msra.mxu1 %v2604_v4  ;;  %v2641_v11 = vld [vmem:[#allocation9 + $0x40] sm:$0xff]  ;;  %v2647_v12 = vld [vmem:[#allocation9 + $0x38] sm:$0xff]  ;;  %v2653_v13 = vld [vmem:[#allocation9 + $0x30] sm:$0xff]  ;;  %s2518_s14 = scalar_lea.vmem %s1607_s3, 256  ;;  %p2523_p7 = scmp.lt.s32.totalorder %s1607_s3, %s1607_s3 }
  0x3c   :  { %131 = vmax.xlane.f32.xlu0 %v2601_v3  ;;  %1914 = vmatpush3.msra.mxu0 %v2606_v5  ;;  %v2659_v14 = vld [vmem:[#allocation9 + $0x28] sm:$0xff]  ;;  %v2665_v15 = vld [vmem:[#allocation9 + $0x20] sm:$0xff]  ;;  %v2671_v16 = vld [vmem:[#allocation9 + $0x18] sm:$0xff]  ;;  %p2519_p6 = scmp.ne.s32.totalorder %s1607_s3, %s2518_s14  ;;  %p2524_p8 = scmp.lt.s32.totalorder %s2518_s14, %s2518_s14 }
  0x3d   :  { %137 = vmax.xlane.f32.xlu1 %v2556_v1  ;;  %1915 = vmatprep.subr.mxu0 %v2611_v6  ;;  %v2677_v17 = vld [vmem:[#allocation9 + $0x10] sm:$0xff]  ;;  %v2683_v18 = vld [vmem:[#allocation9 + $0x8] sm:$0xff]  ;;  %v2689_v19 = vld [vmem:[#allocation9] sm:$0xff] }
  0x3e   :  { %1954 = vmatprep.subr.mxu1 %v2606_v5  ;;  %1916 = vmatpush3.msra.mxu0 %v2611_v6  ;;  %v1720_v22 = vld [vmem:[#allocation4 + $0x10] sm:$0xff]   ;;  %v2712_v26 = vld [vmem:[#allocation7 + $0x1] ss:$0 sm:$0xff]  ;;  %v1719_v27 = vld [vmem:[#allocation4 + $0x8] sm:$0xff]   ;;  %p2525_p9 = por %p2524_p8, %p2523_p7 }
  0x3f   :  { %1955 = vmatpush3.msra.mxu1 %v2606_v5  ;;  %1917 = vmatprep.subr.mxu0 %v2616_v7  ;;  %v1634_v29 = vunpack.c.h.bf16 %v1720_v22  ;;  %v1624_v30 = vld [vmem:[#allocation4] sm:$0xff]   ;;  %v1630_v33 = vunpack.c.h.bf16 %v1719_v27  ;;  %v1633_v47 = vunpack.c.l.bf16 %v1720_v22  ;;  %v1629_v53 = vunpack.c.l.bf16 %v1719_v27 }
  0x40   :  { %133 = vmax.xlane.f32.xlu0 %v2601_v3  ;;  %1918 = vmatpush3.msra.mxu0 %v2616_v7  ;;  %v2715_v31 = vld [vmem:[#allocation7 + $0x2] ss:$0 sm:$0xff]  ;;  %v2719_v34 = vld [vmem:[#allocation7] ss:$0 sm:$0xff]  ;;  %v1626_v37 = vunpack.c.h.bf16 %v1624_v30  ;;  %v1625_v43 = vunpack.c.l.bf16 %v1624_v30  ;;  %p2526_p10 = pnand %p2525_p9, %p2519_p6 }
  0x41   :  { %141 = vmax.xlane.f32.xlu1 %v2556_v1  ;;  %1956 = vmatprep.subr.mxu1 %v2611_v6 }
  0x42   :  { %1919 = vmatprep.subr.mxu0 %v2622_v8  ;;  %1957 = vmatpush3.msra.mxu1 %v2611_v6 }
  0x43   :  { %1920 = vmatpush3.msra.mxu0 %v2622_v8  ;;  %1958 = vmatprep.subr.mxu1 %v2616_v7 }
  0x44   :  { %139 = vmax.xlane.f32.xlu0 %v2556_v1  ;;  %1921 = vmatprep.subr.mxu0 %v2629_v9 }
  0x45   :  { %1959 = vmatpush3.msra.mxu1 %v2616_v7  ;;  %1922 = vmatpush3.msra.mxu0 %v2629_v9 }
  0x46   :  { %1960 = vmatprep.subr.mxu1 %v2622_v8  ;;  %1923 = vmatprep.subr.mxu0 %v2633_v10 }
  0x47   :  { %1961 = vmatpush3.msra.mxu1 %v2622_v8  ;;  %1924 = vmatpush3.msra.mxu0 %v2633_v10 }
  0x48   :  { %1962 = vmatprep.subr.mxu1 %v2629_v9  ;;  %1925 = vmatprep.subr.mxu0 %v2641_v11 }
  0x49   :  { %1963 = vmatpush3.msra.mxu1 %v2629_v9  ;;  %1926 = vmatpush3.msra.mxu0 %v2641_v11 }
  0x4a   :  { %1964 = vmatprep.subr.mxu1 %v2633_v10  ;;  %1927 = vmatprep.subr.mxu0 %v2647_v12 }
  0x4b   :  { %1965 = vmatpush3.msra.mxu1 %v2633_v10  ;;  %1928 = vmatpush3.msra.mxu0 %v2647_v12 }
  0x4c   :  { %1966 = vmatprep.subr.mxu1 %v2641_v11  ;;  %1929 = vmatprep.subr.mxu0 %v2653_v13 }
  0x4d   :  { %1967 = vmatpush3.msra.mxu1 %v2641_v11  ;;  %1930 = vmatpush3.msra.mxu0 %v2653_v13 }
  0x4e   :  { %1968 = vmatprep.subr.mxu1 %v2647_v12  ;;  %1931 = vmatprep.subr.mxu0 %v2659_v14 }
  0x4f   :  { %1969 = vmatpush3.msra.mxu1 %v2647_v12  ;;  %1932 = vmatpush3.msra.mxu0 %v2659_v14 }
  0x50   :  { %1970 = vmatprep.subr.mxu1 %v2653_v13  ;;  %1933 = vmatprep.subr.mxu0 %v2665_v15 }
  0x51   :  { %1971 = vmatpush3.msra.mxu1 %v2653_v13  ;;  %1934 = vmatpush3.msra.mxu0 %v2665_v15 }
  0x52   :  { %1972 = vmatprep.subr.mxu1 %v2659_v14  ;;  %1935 = vmatprep.subr.mxu0 %v2671_v16 }
  0x53   :  { %1973 = vmatpush3.msra.mxu1 %v2659_v14  ;;  %1936 = vmatpush3.msra.mxu0 %v2671_v16 }
  0x54   :  { %1974 = vmatprep.subr.mxu1 %v2665_v15  ;;  %1937 = vmatprep.subr.mxu0 %v2677_v17 }
  0x55   :  { %1975 = vmatpush3.msra.mxu1 %v2665_v15  ;;  %1938 = vmatpush3.msra.mxu0 %v2677_v17 }
  0x56   :  { %1976 = vmatprep.subr.mxu1 %v2671_v16  ;;  %1939 = vmatprep.subr.mxu0 %v2683_v18 }
  0x57   :  { %1977 = vmatpush3.msra.mxu1 %v2671_v16  ;;  %1940 = vmatpush3.msra.mxu0 %v2683_v18 }
  0x58   :  { %1978 = vmatprep.subr.mxu1 %v2677_v17  ;;  %1941 = vmatprep.subr.mxu0 %v2689_v19 }
  0x59   :  { %1979 = vmatpush3.msra.mxu1 %v2677_v17  ;;  %1942 = vmatpush3.msra.mxu0 %v2689_v19 }
  0x5a   :  { %1980 = vmatprep.subr.mxu1 %v2683_v18  ;;  %1993 = vmatprep.subr.mxu0 %v2604_v4 }
  0x5b   :  { %1981 = vmatpush3.msra.mxu1 %v2683_v18 }
  0x5c   :  { %1982 = vmatprep.subr.mxu1 %v2689_v19 }
  0x5d   :  { %1983 = vmatpush3.msra.mxu1 %v2689_v19 }
  0x5e   :  { %2034 = vmatprep.subr.mxu1 %v2604_v4 }
  0xc2   :  { %v2703_v20 = vpop.xlane.xlu1 %135 }
  0xc3   :  { %v145_v23 = vsub.f32 -1000000.0, %v2703_v20  ;;  %v276_v52 = vadd.f32 %v2712_v26, %v2703_v20 }
  0xc5   :  { %v2708_v24 = vpop.xlane.xlu0 %131  ;;  %v153_v38 = vmul.f32 1.442695, %v145_v23  ;;  %v294_v63 = vadd.f32 %v1629_v53, %v276_v52 }
  0xc6   :  { %v2705_v21 = vpop.xlane.xlu1 %137  ;;  %v143_v25 = vsub.f32 %v2601_v3, %v2708_v24  ;;  %v274_v45 = vadd.f32 %v2719_v34, %v2708_v24 }
  0xc7   :  { %v146_v28 = vsub.f32 -1000000.0, %v2705_v21  ;;  %v277_v32 = vadd.f32 %v2712_v26, %v2705_v21 }
  0xc8   :  { %v149_v35 = vmul.f32 1.442695, %v143_v25  ;;  %v2741_v58 = vadd.f32 %v1625_v43, %v274_v45 }
  0xc9   :  { %v2722_v40 = vpop.xlane.xlu0 %133  ;;  %v155_v44 = vmul.f32 1.442695, %v146_v28  ;;  %v2732_v48 = vadd.f32 %v1630_v33, %v277_v32 }
  0xca   :  { %v142_v36 = vpop.xlane.xlu1 %141  ;;  %2251 = vpow2.f32 %v149_v35  ;;  %v144_v41 = vsub.f32 %v2601_v3, %v2722_v40  ;;  %v275_v42 = vadd.f32 %v2719_v34, %v2722_v40 }
  0xcb   :  { %v279_v39 = vadd.f32 %v2715_v31, %v142_v36  ;;  %v148_v49 = vsub.f32 -1000000.0, %v142_v36  ;;  %2253 = vpow2.f32 %v153_v38 }
  0xcc   :  { %v151_v50 = vmul.f32 1.442695, %v144_v41  ;;  %v2734_v51 = vadd.f32 %v1626_v37, %v275_v42 }
  0xcd   :  { %v2730_v46 = vadd.f32 %v1634_v29, %v279_v39  ;;  %v140_v54 = vpop.xlane.xlu0 %139  ;;  %v159_v59 = vmul.f32 1.442695, %v148_v49 }
  0xce   :  { %2255 = vpow2.f32 %v151_v50  ;;  %v147_v56 = vsub.f32 -1000000.0, %v140_v54  ;;  %v278_v57 = vadd.f32 %v2715_v31, %v140_v54 }
  0xcf   :  { %v300_v55 = vmax.f32 %v2734_v51, %v2730_v46  ;;  %2257 = vpow2.f32 %v155_v44 }
  0xd0   :  { %v157_v61 = vmul.f32 1.442695, %v147_v56  ;;  %v2744_v62 = vadd.f32 %v1633_v47, %v278_v57 }
  0xd1   :  { %v301_v60 = vmax.f32 %v300_v55, %v2732_v48 }
  0xd2   :  { %2259 = vpow2.f32 %v157_v61  ;;  %v298_v1 = vmax.f32 %v2741_v58, %v2744_v62 }
  0xd3   :  { %v2746_v0 = vadd.f32 2.0794415, %v301_v60  ;;  %2261 = vpow2.f32 %v159_v59 }
  0xd4   :  { %v299_v22 = vmax.f32 %v298_v1, %v294_v63 }
  0xd5   :  { %v305_v2 = vsub.f32 %v2734_v51, %v2746_v0  ;;  %v307_v23 = vsub.f32 %v2732_v48, %v2746_v0  ;;  %v309_v39 = vsub.f32 %v2730_v46, %v2746_v0 }
  0xd6   :  { %v2754_v25 = vadd.f32 2.0794415, %v299_v22 }
  0xd7   :  { %v2756_v27 = vpop.eup %2251  ;;  %v312_v37 = vmul.f32 1.442695, %v305_v2  ;;  %v316_v38 = vmul.f32 1.442695, %v307_v23  ;;  %v320_v44 = vmul.f32 1.442695, %v309_v39 }
  0xd8   :  { %v304_v28 = vsub.f32 %v2741_v58, %v2754_v25  ;;  %1943 = vmatprep.mubr.f32.mxu0 %v2756_v27  ;;  %v306_v29 = vsub.f32 %v294_v63, %v2754_v25  ;;  %v2762_v30 = vpop.eup %2253  ;;  %v308_v42 = vsub.f32 %v2744_v62, %v2754_v25  ;;  %v1636_v39 = vld [vmem:[#allocation4 + $0x18] sm:$0xff]  }
  0xd9   :  { %2263 = vpow2.f32 %v312_v37 }
  0xda   :  { %v310_v41 = vmul.f32 1.442695, %v304_v28  ;;  %v314_v43 = vmul.f32 1.442695, %v306_v29  ;;  %2265 = vpow2.f32 %v316_v38  ;;  %v318_v45 = vmul.f32 1.442695, %v308_v42 }
  0xdb   :  { %v2764_v32 = vpop.eup %2255  ;;  %v456_v42 = vadd.f32 %v2715_v31, %v2705_v21  ;;  %v1637_v21 = vunpack.c.l.bf16 %v1636_v39 }
  0xdc   :  { %v2766_v33 = vpop.eup %2257  ;;  %1944 = vmatmul.mubr.f32.vlgmr.msra.gmra.mxu0 %v2764_v32  ;;  %2267 = vpow2.f32 %v310_v41  ;;  %v1722_v41 = vld [vmem:[#allocation4 + $0x28] sm:$0xff]  }
  0xdd   :  { %1946 = vmatprep.mubr.f32.mxu0 %v2762_v30  ;;  %1994 = vmatpush3.msra.mxu0 %v2604_v4  ;;  %2269 = vpow2.f32 %v314_v43  ;;  %v1646_v43 = vunpack.c.h.bf16 %v1722_v41 }
  0xde   :  { %1995 = vmatprep.subr.mxu0 %v2606_v5  ;;  %2271 = vpow2.f32 %v320_v44  ;;  %v1638_v44 = vunpack.c.h.bf16 %v1636_v39 }
  0xdf   :  { %v2260_v35 = vpop.eup %2259  ;;  %1996 = vmatpush3.msra.mxu0 %v2606_v5  ;;  %2273 = vpow2.f32 %v318_v45  ;;  %v1721_v45 = vld [vmem:[#allocation4 + $0x20] sm:$0xff]  }
  0xe0   :  { %1947 = vmatmul.mubr.f32.gmra.mxu0 %v2766_v33  ;;  %1997 = vmatprep.subr.mxu0 %v2611_v6  ;;  %v2262_v36 = vpop.eup %2261 }
  0xe1   :  { %1949 = vmatprep.mubr.f32.mxu0 %v2260_v35  ;;  %1998 = vmatpush3.msra.mxu0 %v2611_v6 }
  0xe2   :  { %1999 = vmatprep.subr.mxu0 %v2616_v7 }
  0xe3   :  { %2000 = vmatpush3.msra.mxu0 %v2616_v7 }
  0xe4   :  { %1950 = vmatmul.mubr.f32.gmra.mxu0 %v2262_v36  ;;  %2001 = vmatprep.subr.mxu0 %v2622_v8 }
  0xe5   :  { %2002 = vmatpush3.msra.mxu0 %v2622_v8 }
  0xe6   :  { %2003 = vmatprep.subr.mxu0 %v2629_v9  ;;  %v2264_v49 = vpop.eup %2263 }
  0xe7   :  { %2004 = vmatpush3.msra.mxu0 %v2629_v9  ;;  %v2266_v50 = vpop.eup %2265 }
  0xe8   :  { %2005 = vmatprep.subr.mxu0 %v2633_v10 }
  0xe9   :  { %2006 = vmatpush3.msra.mxu0 %v2633_v10  ;;  %v2268_v52 = vpop.eup %2267 }
  0xea   :  { %2007 = vmatprep.subr.mxu0 %v2641_v11  ;;  %v2270_v54 = vpop.eup %2269 }
  0xeb   :  { %2008 = vmatpush3.msra.mxu0 %v2641_v11  ;;  %v2272_v59 = vpop.eup %2271 }
  0xec   :  { %2009 = vmatprep.subr.mxu0 %v2647_v12  ;;  %v2274_v63 = vpop.eup %2273 }
  0xed   :  { %2010 = vmatpush3.msra.mxu0 %v2647_v12 }
  0xee   :  { %2011 = vmatprep.subr.mxu0 %v2653_v13 }
  0xef   :  { %2012 = vmatpush3.msra.mxu0 %v2653_v13 }
  0xf0   :  { %2013 = vmatprep.subr.mxu0 %v2659_v14 }
  0xf1   :  { %2014 = vmatpush3.msra.mxu0 %v2659_v14 }
  0xf2   :  { %2015 = vmatprep.subr.mxu0 %v2665_v15 }
  0xf3   :  { %2016 = vmatpush3.msra.mxu0 %v2665_v15 }
  0xf4   :  { %2017 = vmatprep.subr.mxu0 %v2671_v16 }
  0xf5   :  { %2018 = vmatpush3.msra.mxu0 %v2671_v16 }
  0xf6   :  { %2019 = vmatprep.subr.mxu0 %v2677_v17 }
  0xf7   :  { %2020 = vmatpush3.msra.mxu0 %v2677_v17 }
  0xf8   :  { %2021 = vmatprep.subr.mxu0 %v2683_v18 }
  0xf9   :  { %2022 = vmatpush3.msra.mxu0 %v2683_v18 }
  0xfa   :  { %2023 = vmatprep.subr.mxu0 %v2689_v19 }
  0xfb   :  { %2024 = vmatpush3.msra.mxu0 %v2689_v19 }
  0xfc   :  { %2075 = vmatprep.subr.mxu0 %v2604_v4 }
 0x19c   :  { %v1945_v47 = vpop.f32.mrf.mxu0 }
 0x19d   :  { %v323_v46 = vmul.f32 %v2264_v49, %v1945_v47 }
 0x19e   :  { %v227_v48 = vpop.f32.mrf.mxu0 }
 0x19f   :  { %v322_v56 = vmul.f32 %v2268_v52, %v227_v48  ;;  %v1642_v48 = vunpack.c.h.bf16 %v1721_v45 }
 0x1a0   :  { %v1948_v51 = vpop.f32.mrf.mxu0 }
 0x1a1   :  { %v325_v53 = vmul.f32 %v2266_v50, %v1948_v51  ;;  %v455_v50 = vadd.f32 %v2715_v31, %v2703_v20  ;;  %v1645_v51 = vunpack.c.l.bf16 %v1722_v41 }
 0x1a2   :  { %v237_v55 = vpop.f32.mrf.mxu0 }
 0x1a3   :  { %v330_v57 = vadd.f32 %v325_v53, %v323_v46  ;;  %v324_v58 = vmul.f32 %v2270_v54, %v237_v55  ;;  %v2829_v46 = vadd.f32 %v1646_v43, %v456_v42  ;;  %v453_v54 = vadd.f32 %v2712_v26, %v2708_v24 }
 0x1a4   :  { %v1951_v60 = vpop.f32.mrf.mxu0  ;;  %v1641_v55 = vunpack.c.l.bf16 %v1721_v45 }
 0x1a5   :  { %v328_v61 = vadd.f32 %v324_v58, %v322_v56  ;;  %v327_v62 = vmul.f32 %v2272_v59, %v1951_v60  ;;  %v2841_v60 = vadd.f32 %v1645_v51, %v455_v50 }
 0x1a6   :  { %v247_v1 = vpop.f32.mrf.mxu0 }
 0x1a7   :  { %v331_v2 = vadd.f32 %v330_v57, %v327_v62  ;;  %v326_v22 = vmul.f32 %v2274_v63, %v247_v1  ;;  %v472_v1 = vadd.f32 %v1641_v55, %v453_v54 }
 0x1a9   :  { %2275 = vlog2.f32 %v331_v2  ;;  %v329_v23 = vadd.f32 %v328_v61, %v326_v22 }
 0x1ab   :  { %2277 = vlog2.f32 %v329_v23 }
 0x1b6   :  { %v2276_v28 = vpop.eup %2275 }
 0x1b7   :  { %v337_v29 = vmul.f32 0.6931472, %v2276_v28 }
 0x1b8   :  { %v2278_v35 = vpop.eup %2277 }
 0x1b9   :  { %v2808_v36 = vadd.f32 %v337_v29, %v2746_v0  ;;  %v335_v37 = vmul.f32 0.6931472, %v2278_v35  ;;  %v454_v0 = vadd.f32 %v2712_v26, %v2722_v40 }
 0x1bb   :  { %348 = vmax.xlane.f32.xlu1 %v2808_v36  ;;  %v2812_v38 = vadd.f32 %v335_v37, %v2754_v25  ;;  %v473_v58 = vadd.f32 %v1642_v48, %v454_v0 }
 0x1bd   :  { %346 = vmax.xlane.f32.xlu0 %v2812_v38 }
 0x244   :  { %v2817_v47 = vpop.xlane.xlu1 %348 }
 0x245   :  { %v351_v25 = vsub.f32 %v2808_v36, %v2817_v47  ;;  %v452_v49 = vadd.f32 %v2719_v34, %v2817_v47 }
 0x246   :  { %v2827_v52 = vpop.xlane.xlu0 %346 }
 0x247   :  { %v2831_v53 = vadd.f32 %v1638_v44, %v452_v49  ;;  %v350_v56 = vsub.f32 %v2812_v38, %v2827_v52  ;;  %v451_v57 = vadd.f32 %v2719_v34, %v2827_v52  ;;  %v354_v20 = vmul.f32 1.442695, %v351_v25 }
 0x249   :  { %v478_v59 = vmax.f32 %v2831_v53, %v2829_v46  ;;  %v352_v61 = vmul.f32 1.442695, %v350_v56  ;;  %v470_v62 = vadd.f32 %v1637_v21, %v451_v57 }
 0x24b   :  { %v479_v63 = vmax.f32 %v478_v59, %v473_v58  ;;  %2279 = vpow2.f32 %v352_v61  ;;  %v476_v2 = vmax.f32 %v470_v62, %v2841_v60 }
 0x24c   :  { %2281 = vpow2.f32 %v354_v20 }
 0x24d   :  { %v2844_v22 = vadd.f32 2.0794415, %v479_v63  ;;  %v477_v23 = vmax.f32 %v476_v2, %v472_v1 }
 0x24f   :  { %v485_v28 = vsub.f32 %v473_v58, %v2844_v22  ;;  %v487_v29 = vsub.f32 %v2829_v46, %v2844_v22  ;;  %v2849_v35 = vadd.f32 2.0794415, %v477_v23 }
 0x251   :  { %v484_v37 = vsub.f32 %v472_v1, %v2849_v35  ;;  %v486_v39 = vsub.f32 %v2841_v60, %v2849_v35  ;;  %v494_v44 = vmul.f32 1.442695, %v485_v28  ;;  %v498_v48 = vmul.f32 1.442695, %v487_v29 }
 0x253   :  { %v492_v0 = vmul.f32 1.442695, %v484_v37  ;;  %v496_v25 = vmul.f32 1.442695, %v486_v39 }
 0x258   :  { %v2854_v41 = vpop.eup %2279 }
 0x259   :  { %v2856_v42 = vpop.eup %2281  ;;  %1984 = vmatprep.mubr.f32.mxu1 %v2854_v41 }
 0x25a   :  { %1985 = vmatmul.mubr.f32.vlgmr.msra.gmra.mxu1 %v2856_v42 }
 0x25b   :  { %1987 = vmatprep.mubr.f32.mxu1 %v2756_v27  ;;  %2035 = vmatpush3.msra.mxu1 %v2604_v4 }
 0x25c   :  { %2036 = vmatprep.subr.mxu1 %v2606_v5 }
 0x25d   :  { %2037 = vmatpush3.msra.mxu1 %v2606_v5 }
 0x25e   :  { %1988 = vmatmul.mubr.f32.gmra.mxu1 %v2764_v32  ;;  %2038 = vmatprep.subr.mxu1 %v2611_v6 }
 0x25f   :  { %1990 = vmatprep.mubr.f32.mxu1 %v2762_v30  ;;  %2039 = vmatpush3.msra.mxu1 %v2611_v6  ;;  %v483_v30 = vsub.f32 %v2831_v53, %v2844_v22 }
 0x260   :  { %2040 = vmatprep.subr.mxu1 %v2616_v7 }
 0x261   :  { %2041 = vmatpush3.msra.mxu1 %v2616_v7  ;;  %v490_v43 = vmul.f32 1.442695, %v483_v30 }
 0x262   :  { %1991 = vmatmul.mubr.f32.gmra.mxu1 %v2766_v33  ;;  %2042 = vmatprep.subr.mxu1 %v2622_v8  ;;  %v482_v33 = vsub.f32 %v470_v62, %v2849_v35 }
 0x263   :  { %2043 = vmatpush3.msra.mxu1 %v2622_v8  ;;  %2283 = vpow2.f32 %v490_v43 }
 0x264   :  { %2044 = vmatprep.subr.mxu1 %v2629_v9  ;;  %v488_v45 = vmul.f32 1.442695, %v482_v33  ;;  %2285 = vpow2.f32 %v494_v44 }
 0x265   :  { %2045 = vmatpush3.msra.mxu1 %v2629_v9 }
 0x266   :  { %2046 = vmatprep.subr.mxu1 %v2633_v10  ;;  %2287 = vpow2.f32 %v488_v45 }
 0x267   :  { %2047 = vmatpush3.msra.mxu1 %v2633_v10  ;;  %2289 = vpow2.f32 %v492_v0 }
 0x268   :  { %2048 = vmatprep.subr.mxu1 %v2641_v11  ;;  %2291 = vpow2.f32 %v498_v48 }
 0x269   :  { %2049 = vmatpush3.msra.mxu1 %v2641_v11  ;;  %2293 = vpow2.f32 %v496_v25 }
 0x26a   :  { %2050 = vmatprep.subr.mxu1 %v2647_v12 }
 0x26b   :  { %2051 = vmatpush3.msra.mxu1 %v2647_v12 }
 0x26c   :  { %2052 = vmatprep.subr.mxu1 %v2653_v13 }
 0x26d   :  { %2053 = vmatpush3.msra.mxu1 %v2653_v13 }
 0x26e   :  { %2054 = vmatprep.subr.mxu1 %v2659_v14 }
 0x26f   :  { %2055 = vmatpush3.msra.mxu1 %v2659_v14 }
 0x270   :  { %2056 = vmatprep.subr.mxu1 %v2665_v15  ;;  %v2284_v51 = vpop.eup %2283 }
 0x271   :  { %2057 = vmatpush3.msra.mxu1 %v2665_v15  ;;  %v2286_v21 = vpop.eup %2285 }
 0x272   :  { %2058 = vmatprep.subr.mxu1 %v2671_v16 }
 0x273   :  { %2059 = vmatpush3.msra.mxu1 %v2671_v16  ;;  %v2288_v53 = vpop.eup %2287 }
 0x274   :  { %2060 = vmatprep.subr.mxu1 %v2677_v17  ;;  %v2290_v56 = vpop.eup %2289 }
 0x275   :  { %2061 = vmatpush3.msra.mxu1 %v2677_v17  ;;  %v2292_v60 = vpop.eup %2291 }
 0x276   :  { %2062 = vmatprep.subr.mxu1 %v2683_v18  ;;  %v2294_v1 = vpop.eup %2293 }
 0x277   :  { %2063 = vmatpush3.msra.mxu1 %v2683_v18 }
 0x278   :  { %2064 = vmatprep.subr.mxu1 %v2689_v19 }
 0x279   :  { %2065 = vmatpush3.msra.mxu1 %v2689_v19 }
 0x27a   :  { %2116 = vmatprep.subr.mxu1 %v2604_v4 }
 0x31a   :  { %v1986_v49 = vpop.f32.mrf.mxu1 }
 0x31b   :  { %v501_v54 = vmul.f32 %v2284_v51, %v1986_v49 }
 0x31c   :  { %v422_v50 = vpop.f32.mrf.mxu1 }
 0x31d   :  { %v500_v58 = vmul.f32 %v2288_v53, %v422_v50 }
 0x31e   :  { %v1989_v46 = vpop.f32.mrf.mxu1 }
 0x31f   :  { %v503_v55 = vmul.f32 %v2286_v21, %v1989_v46  ;;  %v1724_v21 = vld [vmem:[#allocation4 + $0x40] sm:$0xff]   ;;  %v634_v46 = vadd.f32 %v2715_v31, %v2722_v40  ;;  %v631_v40 = vadd.f32 %v2712_v26, %v2827_v52 }
 0x320   :  { %v432_v57 = vpop.f32.mrf.mxu1  ;;  %v1658_v53 = vunpack.c.h.bf16 %v1724_v21 }
 0x321   :  { %v508_v20 = vadd.f32 %v503_v55, %v501_v54  ;;  %v502_v59 = vmul.f32 %v2290_v56, %v432_v57  ;;  %v1723_v56 = vld [vmem:[#allocation4 + $0x38] sm:$0xff]   ;;  %v633_v57 = vadd.f32 %v2715_v31, %v2708_v24 }
 0x322   :  { %v1992_v61 = vpop.f32.mrf.mxu1 }
 0x323   :  { %v506_v62 = vadd.f32 %v502_v59, %v500_v58  ;;  %v505_v63 = vmul.f32 %v2292_v60, %v1992_v61  ;;  %v1657_v58 = vunpack.c.l.bf16 %v1724_v21  ;;  %v653_v59 = vadd.f32 %v1658_v53, %v634_v46 }
 0x324   :  { %v442_v2 = vpop.f32.mrf.mxu1  ;;  %v1654_v60 = vunpack.c.h.bf16 %v1723_v56  ;;  %v632_v61 = vadd.f32 %v2712_v26, %v2817_v47 }
 0x325   :  { %v509_v23 = vadd.f32 %v508_v20, %v505_v63  ;;  %v504_v28 = vmul.f32 %v2294_v1, %v442_v2  ;;  %v652_v63 = vadd.f32 %v1657_v58, %v633_v57  ;;  %v1653_v1 = vunpack.c.l.bf16 %v1723_v56 }
 0x327   :  { %2295 = vlog2.f32 %v509_v23  ;;  %v507_v29 = vadd.f32 %v506_v62, %v504_v28  ;;  %v651_v23 = vadd.f32 %v1654_v60, %v632_v61 }
 0x329   :  { %2297 = vlog2.f32 %v507_v29  ;;  %v650_v29 = vadd.f32 %v1653_v1, %v631_v40 }
 0x334   :  { %v2296_v37 = vpop.eup %2295 }
 0x335   :  { %v515_v39 = vmul.f32 0.6931472, %v2296_v37 }
 0x336   :  { %v2298_v30 = vpop.eup %2297 }
 0x337   :  { %v2900_v33 = vadd.f32 %v515_v39, %v2844_v22  ;;  %v513_v43 = vmul.f32 0.6931472, %v2298_v30 }
 0x339   :  { %526 = vmax.xlane.f32.xlu1 %v2900_v33  ;;  %v2904_v44 = vadd.f32 %v513_v43, %v2849_v35 }
 0x33b   :  { %524 = vmax.xlane.f32.xlu0 %v2904_v44 }
 0x3c2   :  { %v2907_v45 = vpop.xlane.xlu1 %526 }
 0x3c3   :  { %v529_v0 = vsub.f32 %v2900_v33, %v2907_v45  ;;  %v630_v51 = vadd.f32 %v2719_v34, %v2907_v45 }
 0x3c4   :  { %v2911_v48 = vpop.xlane.xlu0 %524 }
 0x3c5   :  { %v528_v25 = vsub.f32 %v2904_v44, %v2911_v48  ;;  %v532_v22 = vmul.f32 1.442695, %v529_v0  ;;  %v629_v55 = vadd.f32 %v2719_v34, %v2911_v48 }
 0x3c7   :  { %v530_v49 = vmul.f32 1.442695, %v528_v25 }
 0x3c9   :  { %2299 = vpow2.f32 %v530_v49 }
 0x3ca   :  { %2301 = vpow2.f32 %v532_v22 }
 0x3d6   :  { %v2915_v50 = vpop.eup %2299 }
 0x3d7   :  { %v2917_v35 = vpop.eup %2301  ;;  %2025 = vmatprep.mubr.f32.mxu0 %v2915_v50 }
 0x3d8   :  { %2026 = vmatmul.mubr.f32.vlgmr.msra.gmra.mxu0 %v2917_v35 }
 0x3d9   :  { %2028 = vmatprep.mubr.f32.mxu0 %v2854_v41  ;;  %2076 = vmatpush3.msra.mxu0 %v2604_v4 }
 0x3da   :  { %2077 = vmatprep.subr.mxu0 %v2606_v5 }
 0x3db   :  { %2078 = vmatpush3.msra.mxu0 %v2606_v5 }
 0x3dc   :  { %2029 = vmatmul.mubr.f32.gmra.mxu0 %v2856_v42  ;;  %2079 = vmatprep.subr.mxu0 %v2611_v6 }
 0x3dd   :  { %2031 = vmatprep.mubr.f32.mxu0 %v2756_v27  ;;  %2080 = vmatpush3.msra.mxu0 %v2611_v6  ;;  %v1648_v27 = vld [vmem:[#allocation4 + $0x30] sm:$0xff]  }
 0x3de   :  { %2081 = vmatprep.subr.mxu0 %v2616_v7  ;;  %v1649_v54 = vunpack.c.l.bf16 %v1648_v27 }
 0x3df   :  { %2082 = vmatpush3.msra.mxu0 %v2616_v7 }
 0x3e0   :  { %2032 = vmatmul.mubr.f32.gmra.mxu0 %v2764_v32  ;;  %2083 = vmatprep.subr.mxu0 %v2622_v8  ;;  %v1650_v32 = vunpack.c.h.bf16 %v1648_v27  ;;  %v648_v62 = vadd.f32 %v1649_v54, %v629_v55 }
 0x3e1   :  { %2084 = vmatpush3.msra.mxu0 %v2622_v8 }
 0x3e2   :  { %2085 = vmatprep.subr.mxu0 %v2629_v9  ;;  %v649_v20 = vadd.f32 %v1650_v32, %v630_v51  ;;  %v654_v28 = vmax.f32 %v648_v62, %v652_v63 }
 0x3e3   :  { %2086 = vmatpush3.msra.mxu0 %v2629_v9 }
 0x3e4   :  { %2087 = vmatprep.subr.mxu0 %v2633_v10  ;;  %v656_v2 = vmax.f32 %v649_v20, %v653_v59  ;;  %v655_v39 = vmax.f32 %v654_v28, %v650_v29 }
 0x3e5   :  { %2088 = vmatpush3.msra.mxu0 %v2633_v10 }
 0x3e6   :  { %2089 = vmatprep.subr.mxu0 %v2641_v11  ;;  %v657_v37 = vmax.f32 %v656_v2, %v651_v23  ;;  %v658_v30 = vadd.f32 2.0794415, %v655_v39 }
 0x3e7   :  { %2090 = vmatpush3.msra.mxu0 %v2641_v11 }
 0x3e8   :  { %2091 = vmatprep.subr.mxu0 %v2647_v12  ;;  %v659_v24 = vadd.f32 2.0794415, %v657_v37  ;;  %v662_v25 = vsub.f32 %v650_v29, %v658_v30  ;;  %v660_v49 = vsub.f32 %v648_v62, %v658_v30  ;;  %v664_v21 = vsub.f32 %v652_v63, %v658_v30 }
 0x3e9   :  { %2092 = vmatpush3.msra.mxu0 %v2647_v12 }
 0x3ea   :  { %2093 = vmatprep.subr.mxu0 %v2653_v13  ;;  %v663_v43 = vsub.f32 %v651_v23, %v659_v24  ;;  %v661_v0 = vsub.f32 %v649_v20, %v659_v24  ;;  %v665_v22 = vsub.f32 %v653_v59, %v659_v24  ;;  %v670_v51 = vmul.f32 1.442695, %v662_v25 }
 0x3eb   :  { %2094 = vmatpush3.msra.mxu0 %v2653_v13  ;;  %v666_v53 = vmul.f32 1.442695, %v660_v49  ;;  %v674_v54 = vmul.f32 1.442695, %v664_v21 }
 0x3ec   :  { %2095 = vmatprep.subr.mxu0 %v2659_v14  ;;  %v672_v27 = vmul.f32 1.442695, %v663_v43  ;;  %v668_v32 = vmul.f32 1.442695, %v661_v0  ;;  %v676_v46 = vmul.f32 1.442695, %v665_v22 }
 0x3ed   :  { %2096 = vmatpush3.msra.mxu0 %v2659_v14 }
 0x3ee   :  { %2097 = vmatprep.subr.mxu0 %v2665_v15  ;;  %2303 = vpow2.f32 %v672_v27 }
 0x3ef   :  { %2098 = vmatpush3.msra.mxu0 %v2665_v15  ;;  %2305 = vpow2.f32 %v668_v32 }
 0x3f0   :  { %2099 = vmatprep.subr.mxu0 %v2671_v16  ;;  %2307 = vpow2.f32 %v670_v51 }
 0x3f1   :  { %2100 = vmatpush3.msra.mxu0 %v2671_v16  ;;  %2309 = vpow2.f32 %v676_v46 }
 0x3f2   :  { %2101 = vmatprep.subr.mxu0 %v2677_v17  ;;  %2311 = vpow2.f32 %v666_v53 }
 0x3f3   :  { %2102 = vmatpush3.msra.mxu0 %v2677_v17  ;;  %2313 = vpow2.f32 %v674_v54 }
 0x3f4   :  { %2103 = vmatprep.subr.mxu0 %v2683_v18 }
 0x3f5   :  { %2104 = vmatpush3.msra.mxu0 %v2683_v18 }
 0x3f6   :  { %2105 = vmatprep.subr.mxu0 %v2689_v19 }
 0x3f7   :  { %2106 = vmatpush3.msra.mxu0 %v2689_v19 }
 0x3f8   :  { %2157 = vmatprep.subr.mxu0 %v2604_v4 }
 0x3fb   :  { %v2304_v57 = vpop.eup %2303 }
 0x3fc   :  { %v2306_v20 = vpop.eup %2305 }
 0x3fd   :  { %v2308_v60 = vpop.eup %2307 }
 0x3fe   :  { %v2310_v62 = vpop.eup %2309 }
 0x3ff   :  { %v2312_v40 = vpop.eup %2311 }
 0x400   :  { %v2314_v37 = vpop.eup %2313 }
 0x498   :  { %v2027_v55 = vpop.f32.mrf.mxu0 }
 0x499   :  { %v679_v1 = vmul.f32 %v2306_v20, %v2027_v55 }
 0x49a   :  { %v600_v56 = vpop.f32.mrf.mxu0 }
 0x49b   :  { %v678_v23 = vmul.f32 %v2312_v40, %v600_v56 }
 0x49c   :  { %v2030_v58 = vpop.f32.mrf.mxu0 }
 0x49d   :  { %v681_v59 = vmul.f32 %v2304_v57, %v2030_v58 }
 0x49e   :  { %v610_v61 = vpop.f32.mrf.mxu0 }
 0x49f   :  { %v680_v63 = vmul.f32 %v2308_v60, %v610_v61  ;;  %v686_v28 = vadd.f32 %v681_v59, %v679_v1 }
 0x4a0   :  { %v2033_v2 = vpop.f32.mrf.mxu0 }
 0x4a1   :  { %v683_v29 = vmul.f32 %v2310_v62, %v2033_v2  ;;  %v684_v43 = vadd.f32 %v680_v63, %v678_v23 }
 0x4a2   :  { %v620_v39 = vpop.f32.mrf.mxu0 }
 0x4a3   :  { %v687_v0 = vadd.f32 %v686_v28, %v683_v29  ;;  %v682_v25 = vmul.f32 %v2314_v37, %v620_v39 }
 0x4a5   :  { %2315 = vlog2.f32 %v687_v0  ;;  %v685_v22 = vadd.f32 %v684_v43, %v682_v25 }
 0x4a7   :  { %2317 = vlog2.f32 %v685_v22 }
 0x4b2   :  { %v2316_v49 = vpop.eup %2315 }
 0x4b3   :  { %v693_v27 = vmul.f32 0.6931472, %v2316_v49 }
 0x4b4   :  { %v2318_v32 = vpop.eup %2317 }
 0x4b5   :  { %v2969_v51 = vadd.f32 %v693_v27, %v659_v24  ;;  %v691_v21 = vmul.f32 0.6931472, %v2318_v32 }
 0x4b7   :  { %704 = vmax.xlane.f32.xlu1 %v2969_v51  ;;  %v2972_v46 = vadd.f32 %v691_v21, %v658_v30 }
 0x4b9   :  { %702 = vmax.xlane.f32.xlu0 %v2972_v46 }
 0x540   :  { %v2975_v53 = vpop.xlane.xlu1 %704 }
 0x541   :  { %v707_v54 = vsub.f32 %v2969_v51, %v2975_v53 }
 0x542   :  { %v2979_v55 = vpop.xlane.xlu0 %702 }
 0x543   :  { %v706_v56 = vsub.f32 %v2972_v46, %v2979_v55  ;;  %v710_v57 = vmul.f32 1.442695, %v707_v54 }
 0x545   :  { %v708_v24 = vmul.f32 1.442695, %v706_v56 }
 0x547   :  { %2319 = vpow2.f32 %v708_v24 }
 0x548   :  { %2321 = vpow2.f32 %v710_v57 }
 0x554   :  { %v2983_v58 = vpop.eup %2319 }
 0x555   :  { %v2985_v30 = vpop.eup %2321  ;;  %2066 = vmatprep.mubr.f32.mxu1 %v2983_v58 }
 0x556   :  { %2067 = vmatmul.mubr.f32.vlgmr.msra.gmra.mxu1 %v2985_v30 }
 0x557   :  { %2069 = vmatprep.mubr.f32.mxu1 %v2915_v50  ;;  %2117 = vmatpush3.msra.mxu1 %v2604_v4  ;;  %v3024_v4 = vld [vmem:[#allocation9 + $0x78] sm:$0xff] }
 0x558   :  { %2118 = vmatprep.subr.mxu1 %v2606_v5 }
 0x559   :  { %2119 = vmatpush3.msra.mxu1 %v2606_v5  ;;  %v1660_v5 = vld [vmem:[#allocation4 + $0x48] sm:$0xff]  }
 0x55a   :  { %2070 = vmatmul.mubr.f32.gmra.mxu1 %v2917_v35  ;;  %2120 = vmatprep.subr.mxu1 %v2611_v6 }
 0x55b   :  { %2072 = vmatprep.mubr.f32.mxu1 %v2854_v41  ;;  %2121 = vmatpush3.msra.mxu1 %v2611_v6  ;;  %v1726_v6 = vld [vmem:[#allocation4 + $0x58] sm:$0xff]  }
 0x55c   :  { %2122 = vmatprep.subr.mxu1 %v2616_v7 }
 0x55d   :  { %2123 = vmatpush3.msra.mxu1 %v2616_v7  ;;  %v1662_v7 = vunpack.c.h.bf16 %v1660_v5 }
 0x55e   :  { %2073 = vmatmul.mubr.f32.gmra.mxu1 %v2856_v42  ;;  %2124 = vmatprep.subr.mxu1 %v2622_v8 }
 0x55f   :  { %2125 = vmatpush3.msra.mxu1 %v2622_v8  ;;  %v808_v8 = vadd.f32 %v2719_v34, %v2975_v53 }
 0x560   :  { %2126 = vmatprep.subr.mxu1 %v2629_v9 }
 0x561   :  { %2127 = vmatpush3.msra.mxu1 %v2629_v9  ;;  %v1670_v9 = vunpack.c.h.bf16 %v1726_v6 }
 0x562   :  { %2128 = vmatprep.subr.mxu1 %v2633_v10 }
 0x563   :  { %2129 = vmatpush3.msra.mxu1 %v2633_v10  ;;  %v812_v10 = vadd.f32 %v2715_v31, %v2817_v47  ;;  %v809_v47 = vadd.f32 %v2712_v26, %v2911_v48 }
 0x564   :  { %2130 = vmatprep.subr.mxu1 %v2641_v11 }
 0x565   :  { %2131 = vmatpush3.msra.mxu1 %v2641_v11  ;;  %v1661_v11 = vunpack.c.l.bf16 %v1660_v5 }
 0x566   :  { %2132 = vmatprep.subr.mxu1 %v2647_v12 }
 0x567   :  { %2133 = vmatpush3.msra.mxu1 %v2647_v12  ;;  %v807_v12 = vadd.f32 %v2719_v34, %v2979_v55 }
 0x568   :  { %2134 = vmatprep.subr.mxu1 %v2653_v13 }
 0x569   :  { %2135 = vmatpush3.msra.mxu1 %v2653_v13  ;;  %v1725_v13 = vld [vmem:[#allocation4 + $0x50] sm:$0xff]   ;;  %v826_v41 = vadd.f32 %v1661_v11, %v807_v12 }
 0x56a   :  { %2136 = vmatprep.subr.mxu1 %v2659_v14  ;;  %v1665_v20 = vunpack.c.l.bf16 %v1725_v13 }
 0x56b   :  { %2137 = vmatpush3.msra.mxu1 %v2659_v14  ;;  %v1669_v14 = vunpack.c.l.bf16 %v1726_v6 }
 0x56c   :  { %2138 = vmatprep.subr.mxu1 %v2665_v15  ;;  %v828_v61 = vadd.f32 %v1665_v20, %v809_v47 }
 0x56d   :  { %2139 = vmatpush3.msra.mxu1 %v2665_v15  ;;  %v811_v15 = vadd.f32 %v2715_v31, %v2827_v52 }
 0x56e   :  { %2140 = vmatprep.subr.mxu1 %v2671_v16 }
 0x56f   :  { %2141 = vmatpush3.msra.mxu1 %v2671_v16  ;;  %v827_v16 = vadd.f32 %v1662_v7, %v808_v8  ;;  %v830_v42 = vadd.f32 %v1669_v14, %v811_v15 }
 0x570   :  { %2142 = vmatprep.subr.mxu1 %v2677_v17 }
 0x571   :  { %2143 = vmatpush3.msra.mxu1 %v2677_v17  ;;  %v831_v17 = vadd.f32 %v1670_v9, %v812_v10  ;;  %v832_v34 = vmax.f32 %v826_v41, %v830_v42 }
 0x572   :  { %2144 = vmatprep.subr.mxu1 %v2683_v18 }
 0x573   :  { %2145 = vmatpush3.msra.mxu1 %v2683_v18  ;;  %v1666_v18 = vunpack.c.h.bf16 %v1725_v13  ;;  %v834_v59 = vmax.f32 %v827_v16, %v831_v17  ;;  %v833_v1 = vmax.f32 %v832_v34, %v828_v61 }
 0x574   :  { %2146 = vmatprep.subr.mxu1 %v2689_v19 }
 0x575   :  { %2147 = vmatpush3.msra.mxu1 %v2689_v19  ;;  %v810_v19 = vadd.f32 %v2712_v26, %v2907_v45  ;;  %v836_v31 = vadd.f32 2.0794415, %v833_v1 }
 0x576   :  { %2198 = vmatprep.subr.mxu1 %v3024_v4 }
 0x577   :  { %v829_v60 = vadd.f32 %v1666_v18, %v810_v19  ;;  %v840_v2 = vsub.f32 %v828_v61, %v836_v31  ;;  %v838_v28 = vsub.f32 %v826_v41, %v836_v31  ;;  %v842_v43 = vsub.f32 %v830_v42, %v836_v31 }
 0x579   :  { %v835_v62 = vmax.f32 %v834_v59, %v829_v60  ;;  %v848_v39 = vmul.f32 1.442695, %v840_v2  ;;  %v844_v25 = vmul.f32 1.442695, %v838_v28  ;;  %v852_v26 = vmul.f32 1.442695, %v842_v43 }
 0x57a   :  { %v3071_v2 = vld [vmem:[#allocation9 + $0x60] sm:$0xff]  ;;  %v3080_v28 = vld [vmem:[#allocation9 + $0x50] sm:$0xff] }
 0x57b   :  { %v837_v63 = vadd.f32 2.0794415, %v835_v62  ;;  %v3104_v43 = vld [vmem:[#allocation9 + $0x20] sm:$0xff] }
 0x57d   :  { %v841_v52 = vsub.f32 %v829_v60, %v837_v63  ;;  %v839_v40 = vsub.f32 %v827_v16, %v837_v63  ;;  %v843_v23 = vsub.f32 %v831_v17, %v837_v63 }
 0x57f   :  { %v850_v29 = vmul.f32 1.442695, %v841_v52  ;;  %v846_v37 = vmul.f32 1.442695, %v839_v40  ;;  %v854_v0 = vmul.f32 1.442695, %v843_v23 }
 0x580   :  { %v3061_v52 = vld [vmem:[#allocation9 + $0x70] sm:$0xff]  ;;  %v3066_v40 = vld [vmem:[#allocation9 + $0x68] sm:$0xff]  ;;  %v3076_v23 = vld [vmem:[#allocation9 + $0x58] sm:$0xff] }
 0x581   :  { %2323 = vpow2.f32 %v850_v29  ;;  %v3088_v29 = vld [vmem:[#allocation9 + $0x40] sm:$0xff] }
 0x582   :  { %2325 = vpow2.f32 %v846_v37  ;;  %v3096_v37 = vld [vmem:[#allocation9 + $0x30] sm:$0xff] }
 0x583   :  { %2327 = vpow2.f32 %v848_v39  ;;  %v3100_v39 = vld [vmem:[#allocation9 + $0x28] sm:$0xff] }
 0x584   :  { %2329 = vpow2.f32 %v854_v0  ;;  %v3108_v0 = vld [vmem:[#allocation9 + $0x18] sm:$0xff] }
 0x585   :  { %2331 = vpow2.f32 %v844_v25  ;;  %v3112_v25 = vld [vmem:[#allocation9 + $0x10] sm:$0xff] }
 0x586   :  { %2333 = vpow2.f32 %v852_v26  ;;  %v3116_v26 = vld [vmem:[#allocation9 + $0x8] sm:$0xff] }
 0x58e   :  { %v2324_v27 = vpop.eup %2323 }
 0x58f   :  { %v2326_v21 = vpop.eup %2325 }
 0x590   :  { %v2328_v56 = vpop.eup %2327 }
 0x591   :  { %v2330_v24 = vpop.eup %2329 }
 0x592   :  { %v2332_v7 = vpop.eup %2331 }
 0x593   :  { %v2334_v12 = vpop.eup %2333 }
 0x616   :  { %v2068_v22 = vpop.f32.mrf.mxu1 }
 0x617   :  { %v857_v5 = vmul.f32 %v2326_v21, %v2068_v22  ;;  %v3120_v22 = vld [vmem:[#allocation9] sm:$0xff]  ;;  %v3124_v21 = vld [vmem:[#allocation7] ss:$0 sm:$0xff] }
 0x618   :  { %v778_v49 = vpop.f32.mrf.mxu1 }
 0x619   :  { %v856_v9 = vmul.f32 %v2332_v7, %v778_v49  ;;  %v1672_v49 = vld [vmem:[#allocation4 + $0x60] sm:$0xff]   ;;  %v1727_v7 = vld [vmem:[#allocation4 + $0x68] sm:$0xff]  }
 0x61a   :  { %v2071_v32 = vpop.f32.mrf.mxu1 }
 0x61b   :  { %v859_v54 = vmul.f32 %v2324_v27, %v2071_v32  ;;  %v1728_v27 = vld [vmem:[#allocation4 + $0x70] sm:$0xff]   ;;  %v1674_v32 = vunpack.c.h.bf16 %v1672_v49 }
 0x61c   :  { %v788_v57 = vpop.f32.mrf.mxu1 }
 0x61d   :  { %v858_v6 = vmul.f32 %v2328_v56, %v788_v57  ;;  %v864_v10 = vadd.f32 %v859_v54, %v857_v5  ;;  %v1682_v56 = vunpack.c.h.bf16 %v1728_v27  ;;  %v3128_v57 = vld [vmem:[#allocation7 + $0x2] ss:$0 sm:$0xff]  ;;  %v1673_v5 = vunpack.c.l.bf16 %v1672_v49 }
 0x61e   :  { %v2074_v8 = vpop.f32.mrf.mxu1 }
 0x61f   :  { %v861_v11 = vmul.f32 %v2330_v24, %v2074_v8  ;;  %v862_v14 = vadd.f32 %v858_v6, %v856_v9  ;;  %v990_v24 = vadd.f32 %v3128_v57, %v2907_v45  ;;  %v1681_v8 = vunpack.c.l.bf16 %v1728_v27 }
 0x620   :  { %v798_v13 = vpop.f32.mrf.mxu1  ;;  %v989_v9 = vadd.f32 %v3128_v57, %v2911_v48  ;;  %v1677_v45 = vunpack.c.l.bf16 %v1727_v7 }
 0x621   :  { %v865_v15 = vadd.f32 %v864_v10, %v861_v11  ;;  %v860_v16 = vmul.f32 %v2334_v12, %v798_v13  ;;  %v1009_v11 = vadd.f32 %v1682_v56, %v990_v24  ;;  %v1678_v12 = vunpack.c.h.bf16 %v1727_v7  ;;  %v3136_v13 = vld [vmem:[#allocation7 + $0x1] ss:$0 sm:$0xff] }
 0x623   :  { %2335 = vlog2.f32 %v865_v15  ;;  %v863_v17 = vadd.f32 %v862_v14, %v860_v16  ;;  %v988_v14 = vadd.f32 %v3136_v13, %v2975_v53  ;;  %v1008_v16 = vadd.f32 %v1681_v8, %v989_v9 }
 0x625   :  { %2337 = vlog2.f32 %v863_v17  ;;  %v987_v17 = vadd.f32 %v3136_v13, %v2979_v55 }
 0x630   :  { %v2336_v18 = vpop.eup %2335 }
 0x631   :  { %v871_v19 = vmul.f32 0.6931472, %v2336_v18 }
 0x632   :  { %v2338_v41 = vpop.eup %2337 }
 0x633   :  { %v3039_v42 = vadd.f32 %v871_v19, %v837_v63  ;;  %v869_v20 = vmul.f32 0.6931472, %v2338_v41  ;;  %v1007_v19 = vadd.f32 %v1678_v12, %v988_v14 }
 0x635   :  { %882 = vmax.xlane.f32.xlu1 %v3039_v42  ;;  %v3042_v47 = vadd.f32 %v869_v20, %v836_v31  ;;  %v1006_v20 = vadd.f32 %v1677_v45, %v987_v17 }
 0x637   :  { %880 = vmax.xlane.f32.xlu0 %v3042_v47 }
 0x6be   :  { %v3045_v59 = vpop.xlane.xlu1 %882 }
 0x6bf   :  { %v885_v60 = vsub.f32 %v3039_v42, %v3045_v59  ;;  %v986_v54 = vadd.f32 %v3124_v21, %v3045_v59 }
 0x6c0   :  { %v3049_v34 = vpop.xlane.xlu0 %880 }
 0x6c1   :  { %v884_v61 = vsub.f32 %v3042_v47, %v3049_v34  ;;  %v888_v62 = vmul.f32 1.442695, %v885_v60  ;;  %v985_v6 = vadd.f32 %v3124_v21, %v3049_v34  ;;  %v1005_v10 = vadd.f32 %v1674_v32, %v986_v54 }
 0x6c3   :  { %v886_v1 = vmul.f32 1.442695, %v884_v61  ;;  %v1004_v15 = vadd.f32 %v1673_v5, %v985_v6  ;;  %v1012_v18 = vmax.f32 %v1005_v10, %v1009_v11 }
 0x6c5   :  { %2339 = vpow2.f32 %v886_v1  ;;  %v1010_v41 = vmax.f32 %v1004_v15, %v1008_v16  ;;  %v1013_v60 = vmax.f32 %v1012_v18, %v1007_v19 }
 0x6c6   :  { %2341 = vpow2.f32 %v888_v62 }
 0x6c7   :  { %v1011_v48 = vmax.f32 %v1010_v41, %v1006_v20  ;;  %v1015_v61 = vadd.f32 2.0794415, %v1013_v60 }
 0x6c9   :  { %v1014_v62 = vadd.f32 2.0794415, %v1011_v48  ;;  %v1019_v1 = vsub.f32 %v1007_v19, %v1015_v61  ;;  %v1017_v49 = vsub.f32 %v1005_v10, %v1015_v61  ;;  %v1021_v32 = vsub.f32 %v1009_v11, %v1015_v61 }
 0x6cb   :  { %v1018_v27 = vsub.f32 %v1006_v20, %v1014_v62  ;;  %v1016_v54 = vsub.f32 %v1004_v15, %v1014_v62  ;;  %v1028_v56 = vmul.f32 1.442695, %v1019_v1  ;;  %v1024_v24 = vmul.f32 1.442695, %v1017_v49 }
 0x6cc   :  { %v1020_v6 = vsub.f32 %v1008_v16, %v1014_v62  ;;  %v1032_v7 = vmul.f32 1.442695, %v1021_v32 }
 0x6cd   :  { %v1026_v5 = vmul.f32 1.442695, %v1018_v27  ;;  %v1022_v8 = vmul.f32 1.442695, %v1016_v54  ;;  %2343 = vpow2.f32 %v1028_v56 }
 0x6ce   :  { %2345 = vpow2.f32 %v1024_v24  ;;  %v1030_v9 = vmul.f32 1.442695, %v1020_v6 }
 0x6cf   :  { %2347 = vpow2.f32 %v1026_v5 }
 0x6d0   :  { %2349 = vpow2.f32 %v1032_v7 }
 0x6d1   :  { %2351 = vpow2.f32 %v1022_v8 }
 0x6d2   :  { %v3053_v63 = vpop.eup %2339  ;;  %2353 = vpow2.f32 %v1030_v9 }
 0x6d3   :  { %v3055_v31 = vpop.eup %2341  ;;  %2107 = vmatprep.mubr.f32.mxu0 %v3053_v63 }
 0x6d4   :  { %2108 = vmatmul.mubr.f32.vlgmr.msra.gmra.mxu0 %v3055_v31 }
 0x6d5   :  { %2110 = vmatprep.mubr.f32.mxu0 %v2983_v58  ;;  %2158 = vmatpush3.msra.mxu0 %v3024_v4 }
 0x6d6   :  { %2159 = vmatprep.subr.mxu0 %v3061_v52 }
 0x6d7   :  { %2160 = vmatpush3.msra.mxu0 %v3061_v52 }
 0x6d8   :  { %2111 = vmatmul.mubr.f32.gmra.mxu0 %v2985_v30  ;;  %2161 = vmatprep.subr.mxu0 %v3066_v40 }
 0x6d9   :  { %2113 = vmatprep.mubr.f32.mxu0 %v2915_v50  ;;  %2162 = vmatpush3.msra.mxu0 %v3066_v40  ;;  %v3084_v50 = vld [vmem:[#allocation9 + $0x48] sm:$0xff] }
 0x6da   :  { %2163 = vmatprep.subr.mxu0 %v3071_v2  ;;  %v2344_v45 = vpop.eup %2343 }
 0x6db   :  { %2164 = vmatpush3.msra.mxu0 %v3071_v2  ;;  %v2346_v17 = vpop.eup %2345 }
 0x6dc   :  { %2114 = vmatmul.mubr.f32.gmra.mxu0 %v2917_v35  ;;  %2165 = vmatprep.subr.mxu0 %v3076_v23  ;;  %v3092_v35 = vld [vmem:[#allocation9 + $0x38] sm:$0xff]  ;;  %v2348_v15 = vpop.eup %2347 }
 0x6dd   :  { %2166 = vmatpush3.msra.mxu0 %v3076_v23  ;;  %v2350_v19 = vpop.eup %2349 }
 0x6de   :  { %2167 = vmatprep.subr.mxu0 %v3080_v28  ;;  %v2352_v20 = vpop.eup %2351 }
 0x6df   :  { %2168 = vmatpush3.msra.mxu0 %v3080_v28  ;;  %v2354_v27 = vpop.eup %2353 }
 0x6e0   :  { %2169 = vmatprep.subr.mxu0 %v3084_v50 }
 0x6e1   :  { %2170 = vmatpush3.msra.mxu0 %v3084_v50 }
 0x6e2   :  { %2171 = vmatprep.subr.mxu0 %v3088_v29 }
 0x6e3   :  { %2172 = vmatpush3.msra.mxu0 %v3088_v29 }
 0x6e4   :  { %2173 = vmatprep.subr.mxu0 %v3092_v35 }
 0x6e5   :  { %2174 = vmatpush3.msra.mxu0 %v3092_v35 }
 0x6e6   :  { %2175 = vmatprep.subr.mxu0 %v3096_v37 }
 0x6e7   :  { %2176 = vmatpush3.msra.mxu0 %v3096_v37 }
 0x6e8   :  { %2177 = vmatprep.subr.mxu0 %v3100_v39 }
 0x6e9   :  { %2178 = vmatpush3.msra.mxu0 %v3100_v39 }
 0x6ea   :  { %2179 = vmatprep.subr.mxu0 %v3104_v43 }
 0x6eb   :  { %2180 = vmatpush3.msra.mxu0 %v3104_v43 }
 0x6ec   :  { %2181 = vmatprep.subr.mxu0 %v3108_v0 }
 0x6ed   :  { %2182 = vmatpush3.msra.mxu0 %v3108_v0 }
 0x6ee   :  { %2183 = vmatprep.subr.mxu0 %v3112_v25 }
 0x6ef   :  { %2184 = vmatpush3.msra.mxu0 %v3112_v25 }
 0x6f0   :  { %2185 = vmatprep.subr.mxu0 %v3116_v26 }
 0x6f1   :  { %2186 = vmatpush3.msra.mxu0 %v3116_v26 }
 0x6f2   :  { %2187 = vmatprep.subr.mxu0 %v3120_v22 }
 0x6f3   :  { %2188 = vmatpush3.msra.mxu0 %v3120_v22 }
 0x794   :  { %v2109_v12 = vpop.f32.mrf.mxu0 }
 0x795   :  { %v1035_v41 = vmul.f32 %v2346_v17, %v2109_v12 }
 0x796   :  { %v956_v14 = vpop.f32.mrf.mxu0 }
 0x797   :  { %v1034_v48 = vmul.f32 %v2352_v20, %v956_v14 }
 0x798   :  { %v2112_v10 = vpop.f32.mrf.mxu0 }
 0x799   :  { %v1037_v11 = vmul.f32 %v2344_v45, %v2112_v10 }
 0x79a   :  { %v966_v18 = vpop.f32.mrf.mxu0 }
 0x79b   :  { %v1036_v16 = vmul.f32 %v2348_v15, %v966_v18  ;;  %v1042_v1 = vadd.f32 %v1037_v11, %v1035_v41 }
 0x79c   :  { %v2115_v60 = vpop.f32.mrf.mxu0 }
 0x79d   :  { %v1039_v49 = vmul.f32 %v2350_v19, %v2115_v60  ;;  %v1040_v54 = vadd.f32 %v1036_v16, %v1034_v48 }
 0x79e   :  { %v976_v32 = vpop.f32.mrf.mxu0 }
 0x79f   :  { %v1043_v56 = vadd.f32 %v1042_v1, %v1039_v49  ;;  %v1038_v24 = vmul.f32 %v2354_v27, %v976_v32 }
 0x7a1   :  { %2355 = vlog2.f32 %v1043_v56  ;;  %v1041_v5 = vadd.f32 %v1040_v54, %v1038_v24 }
 0x7a3   :  { %2357 = vlog2.f32 %v1041_v5 }
 0x7ae   :  { %v2356_v6 = vpop.eup %2355 }
 0x7af   :  { %v1049_v7 = vmul.f32 0.6931472, %v2356_v6 }
 0x7b0   :  { %v2358_v8 = vpop.eup %2357 }
 0x7b1   :  { %v3142_v9 = vadd.f32 %v1049_v7, %v1015_v61  ;;  %v1047_v12 = vmul.f32 0.6931472, %v2358_v8 }
 0x7b3   :  { %1060 = vmax.xlane.f32.xlu1 %v3142_v9  ;;  %v3145_v45 = vadd.f32 %v1047_v12, %v1014_v62 }
 0x7b5   :  { %1058 = vmax.xlane.f32.xlu0 %v3145_v45 }
 0x83c   :  { %v3148_v14 = vpop.xlane.xlu1 %1060 }
 0x83d   :  { %v1063_v10 = vsub.f32 %v3142_v9, %v3148_v14 }
 0x83e   :  { %v3152_v17 = vpop.xlane.xlu0 %1058 }
 0x83f   :  { %v1062_v11 = vsub.f32 %v3145_v45, %v3152_v17  ;;  %v1066_v15 = vmul.f32 1.442695, %v1063_v10 }
 0x841   :  { %v1064_v61 = vmul.f32 1.442695, %v1062_v11 }
 0x843   :  { %2359 = vpow2.f32 %v1064_v61 }
 0x844   :  { %2361 = vpow2.f32 %v1066_v15 }
 0x850   :  { %v3156_v18 = vpop.eup %2359 }
 0x851   :  { %v3158_v62 = vpop.eup %2361  ;;  %2148 = vmatprep.mubr.f32.mxu1 %v3156_v18 }
 0x852   :  { %2149 = vmatmul.mubr.f32.vlgmr.msra.gmra.mxu1 %v3158_v62 }
 0x853   :  { %2151 = vmatprep.mubr.f32.mxu1 %v3053_v63  ;;  %2199 = vmatpush3.msra.mxu1 %v3024_v4 }
 0x854   :  { %2200 = vmatprep.subr.mxu1 %v3061_v52 }
 0x855   :  { %2201 = vmatpush3.msra.mxu1 %v3061_v52  ;;  %v1164_v52 = vadd.f32 %v3124_v21, %v3148_v14 }
 0x856   :  { %2152 = vmatmul.mubr.f32.gmra.mxu1 %v3055_v31  ;;  %2202 = vmatprep.subr.mxu1 %v3066_v40 }
 0x857   :  { %2154 = vmatprep.mubr.f32.mxu1 %v2983_v58  ;;  %2203 = vmatpush3.msra.mxu1 %v3066_v40  ;;  %v1684_v58 = vld [vmem:[#allocation4 + $0x78] sm:$0xff]  }
 0x858   :  { %2204 = vmatprep.subr.mxu1 %v3071_v2  ;;  %v1686_v4 = vunpack.c.h.bf16 %v1684_v58 }
 0x859   :  { %2205 = vmatpush3.msra.mxu1 %v3071_v2  ;;  %v1168_v2 = vadd.f32 %v3128_v57, %v2975_v53  ;;  %v1165_v53 = vadd.f32 %v3136_v13, %v3049_v34 }
 0x85a   :  { %2155 = vmatmul.mubr.f32.gmra.mxu1 %v2985_v30  ;;  %2206 = vmatprep.subr.mxu1 %v3076_v23  ;;  %v1730_v30 = vld [vmem:[#allocation4 + $0x88] sm:$0xff]  }
 0x85b   :  { %2207 = vmatpush3.msra.mxu1 %v3076_v23  ;;  %v1694_v40 = vunpack.c.h.bf16 %v1730_v30  ;;  %v1685_v23 = vunpack.c.l.bf16 %v1684_v58 }
 0x85c   :  { %2208 = vmatprep.subr.mxu1 %v3080_v28 }
 0x85d   :  { %2209 = vmatpush3.msra.mxu1 %v3080_v28  ;;  %v1163_v28 = vadd.f32 %v3124_v21, %v3152_v17 }
 0x85e   :  { %2210 = vmatprep.subr.mxu1 %v3084_v50 }
 0x85f   :  { %2211 = vmatpush3.msra.mxu1 %v3084_v50  ;;  %v1729_v50 = vld [vmem:[#allocation4 + $0x80] sm:$0xff]  }
 0x860   :  { %2212 = vmatprep.subr.mxu1 %v3088_v29 }
 0x861   :  { %2213 = vmatpush3.msra.mxu1 %v3088_v29  ;;  %v1693_v29 = vunpack.c.l.bf16 %v1730_v30 }
 0x862   :  { %2214 = vmatprep.subr.mxu1 %v3092_v35 }
 0x863   :  { %2215 = vmatpush3.msra.mxu1 %v3092_v35  ;;  %v1167_v35 = vadd.f32 %v3128_v57, %v2979_v55 }
 0x864   :  { %2216 = vmatprep.subr.mxu1 %v3096_v37 }
 0x865   :  { %2217 = vmatpush3.msra.mxu1 %v3096_v37  ;;  %v1183_v37 = vadd.f32 %v1686_v4, %v1164_v52 }
 0x866   :  { %2218 = vmatprep.subr.mxu1 %v3100_v39 }
 0x867   :  { %2219 = vmatpush3.msra.mxu1 %v3100_v39  ;;  %v1187_v39 = vadd.f32 %v1694_v40, %v1168_v2 }
 0x868   :  { %2220 = vmatprep.subr.mxu1 %v3104_v43 }
 0x869   :  { %2221 = vmatpush3.msra.mxu1 %v3104_v43  ;;  %v1690_v43 = vunpack.c.h.bf16 %v1729_v50  ;;  %v1190_v19 = vmax.f32 %v1183_v37, %v1187_v39 }
 0x86a   :  { %2222 = vmatprep.subr.mxu1 %v3108_v0 }
 0x86b   :  { %2223 = vmatpush3.msra.mxu1 %v3108_v0  ;;  %v1166_v0 = vadd.f32 %v3136_v13, %v3045_v59 }
 0x86c   :  { %2224 = vmatprep.subr.mxu1 %v3112_v25 }
 0x86d   :  { %2225 = vmatpush3.msra.mxu1 %v3112_v25  ;;  %v1182_v25 = vadd.f32 %v1685_v23, %v1163_v28  ;;  %v1185_v41 = vadd.f32 %v1690_v43, %v1166_v0 }
 0x86e   :  { %2226 = vmatprep.subr.mxu1 %v3116_v26 }
 0x86f   :  { %2227 = vmatpush3.msra.mxu1 %v3116_v26  ;;  %v1186_v26 = vadd.f32 %v1693_v29, %v1167_v35  ;;  %v1191_v60 = vmax.f32 %v1190_v19, %v1185_v41 }
 0x870   :  { %2228 = vmatprep.subr.mxu1 %v3120_v22 }
 0x871   :  { %2229 = vmatpush3.msra.mxu1 %v3120_v22  ;;  %v1689_v22 = vunpack.c.l.bf16 %v1729_v50  ;;  %v1188_v16 = vmax.f32 %v1182_v25, %v1186_v26  ;;  %v1193_v1 = vadd.f32 2.0794415, %v1191_v60 }
 0x873   :  { %v1184_v20 = vadd.f32 %v1689_v22, %v1165_v53  ;;  %v1197_v49 = vsub.f32 %v1185_v41, %v1193_v1  ;;  %v1195_v27 = vsub.f32 %v1183_v37, %v1193_v1  ;;  %v1199_v54 = vsub.f32 %v1187_v39, %v1193_v1 }
 0x875   :  { %v1189_v48 = vmax.f32 %v1188_v16, %v1184_v20  ;;  %v1206_v24 = vmul.f32 1.442695, %v1197_v49  ;;  %v1202_v5 = vmul.f32 1.442695, %v1195_v27  ;;  %v1210_v8 = vmul.f32 1.442695, %v1199_v54 }
 0x877   :  { %v1192_v55 = vadd.f32 2.0794415, %v1189_v48  ;;  %2363 = vpow2.f32 %v1206_v24 }
 0x878   :  { %2365 = vpow2.f32 %v1202_v5  ;;  %v1696_v5 = vld [vmem:[#allocation4 + $0x90] sm:$0xff]  }
 0x879   :  { %v1196_v32 = vsub.f32 %v1184_v20, %v1192_v55  ;;  %v1194_v56 = vsub.f32 %v1182_v25, %v1192_v55  ;;  %v1198_v7 = vsub.f32 %v1186_v26, %v1192_v55 }
 0x87b   :  { %v1204_v6 = vmul.f32 1.442695, %v1196_v32  ;;  %v1200_v12 = vmul.f32 1.442695, %v1194_v56  ;;  %v1208_v10 = vmul.f32 1.442695, %v1198_v7  ;;  %v1698_v7 = vunpack.c.h.bf16 %v1696_v5 }
 0x87d   :  { %2367 = vpow2.f32 %v1204_v6  ;;  %v1732_v6 = vld [vmem:[#allocation4 + $0xa0] sm:$0xff]  }
 0x87e   :  { %2369 = vpow2.f32 %v1210_v8 }
 0x87f   :  { %2371 = vpow2.f32 %v1200_v12  ;;  %v1706_v12 = vunpack.c.h.bf16 %v1732_v6 }
 0x880   :  { %2373 = vpow2.f32 %v1208_v10  ;;  %v1346_v10 = vadd.f32 %v3128_v57, %v3045_v59  ;;  %v1343_v59 = vadd.f32 %v3136_v13, %v3152_v17 }
 0x884   :  { %v2364_v61 = vpop.eup %2363 }
 0x885   :  { %v2366_v30 = vpop.eup %2365 }
 0x88a   :  { %v2368_v52 = vpop.eup %2367 }
 0x88b   :  { %v2370_v2 = vpop.eup %2369 }
 0x88c   :  { %v2372_v50 = vpop.eup %2371 }
 0x88d   :  { %v2374_v43 = vpop.eup %2373 }
 0x912   :  { %v2150_v11 = vpop.f32.mrf.mxu1 }
 0x913   :  { %v1213_v23 = vmul.f32 %v2366_v30, %v2150_v11  ;;  %v1697_v11 = vunpack.c.l.bf16 %v1696_v5  ;;  %v1365_v30 = vadd.f32 %v1706_v12, %v1346_v10 }
 0x914   :  { %v1134_v15 = vpop.f32.mrf.mxu1 }
 0x915   :  { %v1212_v35 = vmul.f32 %v2372_v50, %v1134_v15 }
 0x916   :  { %v2153_v58 = vpop.f32.mrf.mxu1 }
 0x917   :  { %v1215_v4 = vmul.f32 %v2364_v61, %v2153_v58  ;;  %v1731_v61 = vld [vmem:[#allocation4 + $0x98] sm:$0xff]   ;;  %v1705_v58 = vunpack.c.l.bf16 %v1732_v6 }
 0x918   :  { %v1144_v40 = vpop.f32.mrf.mxu1 }
 0x919   :  { %v1214_v28 = vmul.f32 %v2368_v52, %v1144_v40  ;;  %v1220_v37 = vadd.f32 %v1215_v4, %v1213_v23  ;;  %v1702_v4 = vunpack.c.h.bf16 %v1731_v61  ;;  %v1344_v52 = vadd.f32 %v3136_v13, %v3148_v14 }
 0x91a   :  { %v2156_v29 = vpop.f32.mrf.mxu1  ;;  %v1701_v23 = vunpack.c.l.bf16 %v1731_v61 }
 0x91b   :  { %v1217_v39 = vmul.f32 %v2370_v2, %v2156_v29  ;;  %v1218_v25 = vadd.f32 %v1214_v28, %v1212_v35  ;;  %v1363_v50 = vadd.f32 %v1702_v4, %v1344_v52 }
 0x91c   :  { %v1154_v0 = vpop.f32.mrf.mxu1  ;;  %v1362_v35 = vadd.f32 %v1701_v23, %v1343_v59 }
 0x91d   :  { %v1221_v26 = vadd.f32 %v1220_v37, %v1217_v39  ;;  %v1216_v22 = vmul.f32 %v2374_v43, %v1154_v0 }
 0x91f   :  { %2375 = vlog2.f32 %v1221_v26  ;;  %v1219_v53 = vadd.f32 %v1218_v25, %v1216_v22 }
 0x921   :  { %2377 = vlog2.f32 %v1219_v53 }
 0x92c   :  { %v2376_v19 = vpop.eup %2375 }
 0x92d   :  { %v1227_v41 = vmul.f32 0.6931472, %v2376_v19 }
 0x92e   :  { %v2378_v16 = vpop.eup %2377 }
 0x92f   :  { %v3209_v20 = vadd.f32 %v1227_v41, %v1193_v1  ;;  %v1225_v60 = vmul.f32 0.6931472, %v2378_v16 }
 0x931   :  { %1238 = vmax.xlane.f32.xlu1 %v3209_v20  ;;  %v3212_v48 = vadd.f32 %v1225_v60, %v1192_v55 }
 0x933   :  { %1236 = vmax.xlane.f32.xlu0 %v3212_v48 }
 0x9ba   :  { %v3215_v49 = vpop.xlane.xlu1 %1238 }
 0x9bb   :  { %v1241_v27 = vsub.f32 %v3209_v20, %v3215_v49  ;;  %v1342_v8 = vadd.f32 %v3124_v21, %v3215_v49 }
 0x9bc   :  { %v3219_v32 = vpop.xlane.xlu0 %1236 }
 0x9bd   :  { %v1240_v54 = vsub.f32 %v3212_v48, %v3219_v32  ;;  %v1244_v56 = vmul.f32 1.442695, %v1241_v27  ;;  %v1341_v15 = vadd.f32 %v3124_v21, %v3219_v32 }
 0x9bf   :  { %v1242_v1 = vmul.f32 1.442695, %v1240_v54  ;;  %v1360_v40 = vadd.f32 %v1697_v11, %v1341_v15 }
 0x9c1   :  { %2379 = vpow2.f32 %v1242_v1 }
 0x9c2   :  { %2381 = vpow2.f32 %v1244_v56 }
 0x9ce   :  { %v3223_v24 = vpop.eup %2379 }
 0x9cf   :  { %v3225_v55 = vpop.eup %2381  ;;  %2189 = vmatprep.mubr.f32.mxu0 %v3223_v24 }
 0x9d0   :  { %2190 = vmatmul.mubr.f32.vlgmr.msra.gmra.mxu0 %v3225_v55 }
 0x9d1   :  { %2192 = vmatprep.mubr.f32.mxu0 %v3156_v18 }
 0x9d4   :  { %2193 = vmatmul.mubr.f32.gmra.mxu0 %v3158_v62 }
 0x9d5   :  { %2195 = vmatprep.mubr.f32.mxu0 %v3053_v63  ;;  %v1345_v63 = vadd.f32 %v3128_v57, %v3049_v34 }
 0x9d7   :  { %v1364_v2 = vadd.f32 %v1705_v58, %v1345_v63 }
 0x9d8   :  { %2196 = vmatmul.mubr.f32.gmra.mxu0 %v3055_v31  ;;  %v1361_v31 = vadd.f32 %v1698_v7, %v1342_v8 }
 0x9d9   :  { %v1366_v29 = vmax.f32 %v1360_v40, %v1364_v2 }
 0x9da   :  { %v1368_v28 = vmax.f32 %v1361_v31, %v1365_v30 }
 0x9db   :  { %v1367_v39 = vmax.f32 %v1366_v29, %v1362_v35 }
 0x9dc   :  { %v1369_v37 = vmax.f32 %v1368_v28, %v1363_v50 }
 0x9dd   :  { %v1370_v34 = vadd.f32 2.0794415, %v1367_v39 }
 0x9de   :  { %v1371_v43 = vadd.f32 2.0794415, %v1369_v37 }
 0x9df   :  { %v1374_v26 = vsub.f32 %v1362_v35, %v1370_v34  ;;  %v1372_v53 = vsub.f32 %v1360_v40, %v1370_v34  ;;  %v1376_v60 = vsub.f32 %v1364_v2, %v1370_v34 }
 0x9e0   :  { %v1375_v0 = vsub.f32 %v1363_v50, %v1371_v43  ;;  %v1373_v25 = vsub.f32 %v1361_v31, %v1371_v43  ;;  %v1377_v22 = vsub.f32 %v1365_v30, %v1371_v43 }
 0x9e1   :  { %v1382_v16 = vmul.f32 1.442695, %v1374_v26  ;;  %v1378_v54 = vmul.f32 1.442695, %v1372_v53  ;;  %v1386_v56 = vmul.f32 1.442695, %v1376_v60 }
 0x9e2   :  { %v1384_v19 = vmul.f32 1.442695, %v1375_v0  ;;  %v1380_v41 = vmul.f32 1.442695, %v1373_v25  ;;  %v1388_v27 = vmul.f32 1.442695, %v1377_v22 }
 0x9e4   :  { %2383 = vpow2.f32 %v1384_v19 }
 0x9e5   :  { %2385 = vpow2.f32 %v1380_v41 }
 0x9e6   :  { %2387 = vpow2.f32 %v1382_v16 }
 0x9e7   :  { %2389 = vpow2.f32 %v1388_v27  ;;  %v1734_v27 = vld [vmem:[#allocation4 + $0xb8] sm:$0xff]  }
 0x9e8   :  { %2391 = vpow2.f32 %v1378_v54 }
 0x9e9   :  { %2393 = vpow2.f32 %v1386_v56 }
 0x9f1   :  { %v2384_v6 = vpop.eup %2383 }
 0x9f2   :  { %v2386_v8 = vpop.eup %2385 }
 0x9f3   :  { %v2388_v10 = vpop.eup %2387 }
 0x9f4   :  { %v2390_v15 = vpop.eup %2389 }
 0x9f5   :  { %v2392_v63 = vpop.eup %2391 }
 0x9f6   :  { %v2394_v40 = vpop.eup %2393 }
 0xa90   :  { %v2191_v1 = vpop.f32.mrf.mxu0 }
 0xa91   :  { %v1391_v61 = vmul.f32 %v2386_v8, %v2191_v1  ;;  %v1524_v1 = vadd.f32 %v3128_v57, %v3148_v14  ;;  %v1733_v8 = vld [vmem:[#allocation4 + $0xb0] sm:$0xff]   ;;  %v1521_v14 = vadd.f32 %v3136_v13, %v3219_v32 }
 0xa92   :  { %v1312_v5 = vpop.f32.mrf.mxu0 }
 0xa93   :  { %v1390_v30 = vmul.f32 %v2392_v63, %v1312_v5  ;;  %v1718_v5 = vunpack.c.h.bf16 %v1734_v27 }
 0xa94   :  { %v2194_v7 = vpop.f32.mrf.mxu0 }
 0xa95   :  { %v1393_v12 = vmul.f32 %v2384_v6, %v2194_v7 }
 0xa96   :  { %v1322_v11 = vpop.f32.mrf.mxu0 }
 0xa97   :  { %v1392_v58 = vmul.f32 %v2388_v10, %v1322_v11  ;;  %v1398_v4 = vadd.f32 %v1393_v12, %v1391_v61  ;;  %v1714_v12 = vunpack.c.h.bf16 %v1733_v8  ;;  %v1543_v10 = vadd.f32 %v1718_v5, %v1524_v1 }
 0xa98   :  { %v2197_v31 = vpop.f32.mrf.mxu0 }
 0xa99   :  { %v1395_v52 = vmul.f32 %v2390_v15, %v2197_v31  ;;  %v1396_v23 = vadd.f32 %v1392_v58, %v1390_v30  ;;  %v1713_v15 = vunpack.c.l.bf16 %v1733_v8 }
 0xa9a   :  { %v1332_v2 = vpop.f32.mrf.mxu0 }
 0xa9b   :  { %v1399_v59 = vadd.f32 %v1398_v4, %v1395_v52  ;;  %v1394_v28 = vmul.f32 %v2394_v40, %v1332_v2  ;;  %v1540_v31 = vadd.f32 %v1713_v15, %v1521_v14 }
 0xa9d   :  { %2395 = vlog2.f32 %v1399_v59  ;;  %v1397_v50 = vadd.f32 %v1396_v23, %v1394_v28 }
 0xa9f   :  { %2397 = vlog2.f32 %v1397_v50 }
 0xaaa   :  { %v2396_v29 = vpop.eup %2395 }
 0xaab   :  { %v1405_v35 = vmul.f32 0.6931472, %v2396_v29 }
 0xaac   :  { %v2398_v37 = vpop.eup %2397 }
 0xaad   :  { %v3245_v39 = vadd.f32 %v1405_v35, %v1371_v43  ;;  %v1403_v0 = vmul.f32 0.6931472, %v2398_v37 }
 0xaaf   :  { %1416 = vmax.xlane.f32.xlu1 %v3245_v39  ;;  %v3248_v25 = vadd.f32 %v1403_v0, %v1370_v34  ;;  %v1708_v34 = vld [vmem:[#allocation4 + $0xa8] sm:$0xff]  }
 0xab0   :  { %v1710_v54 = vunpack.c.h.bf16 %v1708_v34  ;;  %v1709_v6 = vunpack.c.l.bf16 %v1708_v34 }
 0xab1   :  { %1414 = vmax.xlane.f32.xlu0 %v3248_v25 }
 0xb38   :  { %v1417_v26 = vpop.xlane.xlu1 %1416 }
 0xb39   :  { %v1419_v22 = vsub.f32 %v3245_v39, %v1417_v26  ;;  %v1520_v56 = vadd.f32 %v3124_v21, %v1417_v26 }
 0xb3a   :  { %v1415_v53 = vpop.xlane.xlu0 %1414 }
 0xb3b   :  { %v1418_v19 = vsub.f32 %v3248_v25, %v1415_v53  ;;  %v1422_v41 = vmul.f32 1.442695, %v1419_v22  ;;  %v1519_v7 = vadd.f32 %v3124_v21, %v1415_v53 }
 0xb3d   :  { %v1420_v16 = vmul.f32 1.442695, %v1418_v19  ;;  %v1538_v11 = vadd.f32 %v1709_v6, %v1519_v7 }
 0xb3f   :  { %2399 = vpow2.f32 %v1420_v16 }
 0xb40   :  { %2401 = vpow2.f32 %v1422_v41 }
 0xb4c   :  { %v2400_v60 = vpop.eup %2399 }
 0xb4d   :  { %v2402_v43 = vpop.eup %2401  ;;  %2230 = vmatprep.mubr.f32.mxu1 %v2400_v60 }
 0xb4e   :  { %2231 = vmatmul.mubr.f32.vlgmr.msra.gmra.mxu1 %v2402_v43 }
 0xb4f   :  { %2233 = vmatprep.mubr.f32.mxu1 %v3223_v24  ;;  %v1523_v24 = vadd.f32 %v3128_v57, %v3152_v17 }
 0xb52   :  { %2234 = vmatmul.mubr.f32.gmra.mxu1 %v3225_v55  ;;  %v1539_v55 = vadd.f32 %v1710_v54, %v1520_v56 }
 0xb53   :  { %2236 = vmatprep.mubr.f32.mxu1 %v3156_v18  ;;  %v1717_v18 = vunpack.c.l.bf16 %v1734_v27 }
 0xb54   :  { %v1546_v61 = vmax.f32 %v1539_v55, %v1543_v10 }
 0xb55   :  { %v1542_v58 = vadd.f32 %v1717_v18, %v1523_v24 }
 0xb56   :  { %2237 = vmatmul.mubr.f32.gmra.mxu1 %v3158_v62  ;;  %v1522_v62 = vadd.f32 %v3136_v13, %v3215_v49 }
 0xb57   :  { %v1544_v21 = vmax.f32 %v1538_v11, %v1542_v58 }
 0xb58   :  { %v1541_v63 = vadd.f32 %v1714_v12, %v1522_v62  ;;  %v118_v12 = vld [vmem:[#allocation10 + $0x8] sm:$0xff]  ;;  %v117_v62 = vld [vmem:[#allocation10] sm:$0xff] }
 0xb59   :  { %v1545_v4 = vmax.f32 %v1544_v21, %v1540_v31  ;;  %vm342_vm1 = vcmp.eq.s32.totalorder %v118_v12, 1  ;;  %vm341_vm2 = vcmp.eq.s32.totalorder %v117_v62, 1  ;;  %vm520_vm3 = vcmp.eq.s32.totalorder %v118_v12, 2 }
 0xb5a   :  { %v1547_v30 = vmax.f32 %v1546_v61, %v1541_v63  ;;  %vm519_vm4 = vcmp.eq.s32.totalorder %v117_v62, 2  ;;  %vm698_vm5 = vcmp.eq.s32.totalorder %v118_v12, 3  ;;  %vm697_vm6 = vcmp.eq.s32.totalorder %v117_v62, 3 }
 0xb5b   :  { %v3269_v17 = vadd.f32 2.0794415, %v1545_v4  ;;  %vm876_vm7 = vcmp.eq.s32.totalorder %v118_v12, 4  ;;  %vm875_vm8 = vcmp.eq.s32.totalorder %v117_v62, 4  ;;  %vm1054_vm9 = vcmp.eq.s32.totalorder %v118_v12, 5 }
 0xb5c   :  { %v3267_v57 = vadd.f32 2.0794415, %v1547_v30  ;;  %vm1232_vm10 = vcmp.eq.s32.totalorder %v118_v12, 6  ;;  %vm1053_vm11 = vcmp.eq.s32.totalorder %v117_v62, 5  ;;  %vm1410_vm12 = vcmp.eq.s32.totalorder %v118_v12, 7 }
 0xb5d   :  { %v1552_v40 = vsub.f32 %v1540_v31, %v3269_v17  ;;  %v1550_v13 = vsub.f32 %v1538_v11, %v3269_v17  ;;  %v1554_v59 = vsub.f32 %v1542_v58, %v3269_v17  ;;  %v343_v11 = vsel %vm341_vm2, %v2812_v38, %v2601_v3 }
 0xb5e   :  { %v1553_v52 = vsub.f32 %v1541_v63, %v3267_v57  ;;  %v1551_v49 = vsub.f32 %v1539_v55, %v3267_v57  ;;  %v1555_v2 = vsub.f32 %v1543_v10, %v3267_v57  ;;  %v344_v10 = vsel %vm342_vm1, %v2808_v36, %v2601_v3 }
 0xb5f   :  { %v1560_v28 = vmul.f32 1.442695, %v1552_v40  ;;  %v1556_v29 = vmul.f32 1.442695, %v1550_v13  ;;  %v1564_v35 = vmul.f32 1.442695, %v1554_v59  ;;  %v522_v15 = vsel %vm520_vm3, %v2900_v33, %v344_v10 }
 0xb60   :  { %v1562_v32 = vmul.f32 1.442695, %v1553_v52  ;;  %v1558_v23 = vmul.f32 1.442695, %v1551_v49  ;;  %v1566_v50 = vmul.f32 1.442695, %v1555_v2  ;;  %v521_v14 = vsel %vm519_vm4, %v2904_v44, %v343_v11 }
 0xb61   :  { %v700_v58 = vsel %vm698_vm5, %v2969_v51, %v522_v15  ;;  %v699_v63 = vsel %vm697_vm6, %v2972_v46, %v521_v14  ;;  %vm1231_vm13 = vcmp.eq.s32.totalorder %v117_v62, 6  ;;  %vm1588_vm14 = vcmp.eq.s32.totalorder %v118_v12, 8 }
 0xb62   :  { %2403 = vpow2.f32 %v1562_v32  ;;  %v878_v21 = vsel %vm876_vm7, %v3039_v42, %v700_v58  ;;  %v877_v3 = vsel %vm875_vm8, %v3042_v47, %v699_v63  ;;  %vm1409_vm15 = vcmp.eq.s32.totalorder %v117_v62, 7 }
 0xb63   :  { %2405 = vpow2.f32 %v1558_v23  ;;  %v1056_v38 = vsel %vm1054_vm9, %v3142_v9, %v878_v21  ;;  %v1055_v46 = vsel %vm1053_vm11, %v3145_v45, %v877_v3  ;;  %vm1587_vm0 = vcmp.eq.s32.totalorder %v117_v62, 8 }
 0xb64   :  { %2407 = vpow2.f32 %v1560_v28  ;;  %v1234_v33 = vsel %vm1232_vm10, %v3209_v20, %v1056_v38  ;;  %v1233_v30 = vsel %vm1231_vm13, %v3212_v48, %v1055_v46 }
 0xb65   :  { %2409 = vpow2.f32 %v1566_v50  ;;  %v1412_v42 = vsel %vm1410_vm12, %v3245_v39, %v1234_v33  ;;  %v1411_v4 = vsel %vm1409_vm15, %v3248_v25, %v1233_v30 }
 0xb66   :  { %2411 = vpow2.f32 %v1556_v29 }
 0xb67   :  { %2413 = vpow2.f32 %v1564_v35 }
 0xb6f   :  { %v2404_v26 = vpop.eup %2403 }
 0xb70   :  { %v2406_v53 = vpop.eup %2405 }
 0xb71   :  { %v2408_v41 = vpop.eup %2407 }
 0xb72   :  { %v2410_v60 = vpop.eup %2409 }
 0xb73   :  { %v2412_v27 = vpop.eup %2411 }
 0xb74   :  { %v2414_v6 = vpop.eup %2413 }
 0xc0e   :  { %v2232_v37 = vpop.f32.mrf.mxu1 }
 0xc0f   :  { %v1569_v43 = vmul.f32 %v2406_v53, %v2232_v37 }
 0xc10   :  { %v1490_v0 = vpop.f32.mrf.mxu1 }
 0xc11   :  { %v1568_v56 = vmul.f32 %v2412_v27, %v1490_v0 }
 0xc12   :  { %v2235_v22 = vpop.f32.mrf.mxu1 }
 0xc13   :  { %v1571_v19 = vmul.f32 %v2404_v26, %v2235_v22 }
 0xc14   :  { %v1500_v16 = vpop.f32.mrf.mxu1 }
 0xc15   :  { %v1570_v34 = vmul.f32 %v2408_v41, %v1500_v16  ;;  %v1576_v1 = vadd.f32 %v1571_v19, %v1569_v43 }
 0xc16   :  { %v2238_v54 = vpop.f32.mrf.mxu1 }
 0xc17   :  { %v1573_v5 = vmul.f32 %v2410_v60, %v2238_v54  ;;  %v1574_v8 = vadd.f32 %v1570_v34, %v1568_v56 }
 0xc18   :  { %v1510_v7 = vpop.f32.mrf.mxu1 }
 0xc19   :  { %v1577_v24 = vadd.f32 %v1576_v1, %v1573_v5  ;;  %v1572_v55 = vmul.f32 %v2414_v6, %v1510_v7 }
 0xc1b   :  { %2415 = vlog2.f32 %v1577_v24  ;;  %v1575_v18 = vadd.f32 %v1574_v8, %v1572_v55 }
 0xc1d   :  { %2417 = vlog2.f32 %v1575_v18 }
 0xc28   :  { %v2416_v61 = vpop.eup %2415 }
 0xc29   :  { %v1583_v36 = vmul.f32 0.6931472, %v2416_v61 }
 0xc2a   :  { %v2418_v31 = vpop.eup %2417 }
 0xc2b   :  { %v1585_v44 = vadd.f32 %v1583_v36, %v3267_v57  ;;  %v1581_v51 = vmul.f32 0.6931472, %v2418_v31 }
 0xc2d   :  { %v1584_v47 = vadd.f32 %v1581_v51, %v3269_v17  ;;  %v1590_v9 = vsel %vm1588_vm14, %v1585_v44, %v1412_v42 }
 0xc2e   :  { %1600 = vst [vmem:[#allocation12 + $0x8] sm:$0xff] %v1590_v9 }
 0xc2f   :  { %v1589_v20 = vsel %vm1587_vm0, %v1584_v47, %v1411_v4 }
 0xc30   :  { %1599 = vst [vmem:[#allocation12] sm:$0xff] %v1589_v20 }
 0xc31   :  { %2529 = shalt.err (!%p2526_p10)
}
 0xc32   :  { %1612 = dma.vmem_to_hbm [thread:$0]  %s1607_s3, 256, %s3305_s4, [#allocation6], %s2553_s6, %s2553_s6, %s2554_s7  }
 0xc33   :  { %2544 = dma.done.wait [#allocation6], 256  }
 0xc34   :  { %2545 = vsyncadd [#allocation6], 4294967040 }
 0xc35   :  { %1616 = vsyncpa [#allocation5], 1 }
 0xc36   :  { %1617 = vsyncpa [#allocation8], 1 }
 0xc37   :  { %1618 = vsyncpa [#allocation11], 1 }
 0xc38   :  { %1619 = vsyncpa [#allocation6], 1 }

</bundles_post_ra>
